<compile_context>
chip_gen: v7x
topology: tpu7x:2x2x1
jax: 0.10.0
libtpu: 0.0.40
codegen_flags: <defaults>
</compile_context>

<pallas_src>
import functools
import math

import jax
import jax.numpy as jnp
from jax.experimental import pallas as pl
from jax.experimental.pallas import tpu as pltpu


def gru_chunk_kernel(gir_ref, giz_ref, gin_ref,
                     whr_ref, whz_ref, whn_ref, bhn_ref,
                     out_ref, h_scratch, *, chunk):
    """Process one chunk of `chunk` timesteps. Grid axis 0 = time chunks (sequential)."""

    # PyTorch default h0 = zeros; initialize once at the first chunk.
    @pl.when(pl.program_id(0) == 0)
    def _():
        h_scratch[...] = jnp.zeros_like(h_scratch)

    # Weights are small, bf16, constant across the chunk: load once.
    w_r = whr_ref[...]          # (H, H) bf16
    w_z = whz_ref[...]          # (H, H) bf16
    w_n = whn_ref[...]          # (H, H) bf16
    b_hn = bhn_ref[...]         # (1, H) fp32

    def step(tt, h):
        # Recurrent projections on the MXU: bf16 operands, fp32 accumulation.
        hb = h.astype(jnp.bfloat16)
        h_r = jnp.dot(hb, w_r, preferred_element_type=jnp.float32)
        h_z = jnp.dot(hb, w_z, preferred_element_type=jnp.float32)
        h_n = jnp.dot(hb, w_n, preferred_element_type=jnp.float32) + b_hn

        # Hoisted input projections already include b_ir+b_hr, b_iz+b_hz, b_in.
        r = jax.nn.sigmoid(gir_ref[tt] + h_r)
        z = jax.nn.sigmoid(giz_ref[tt] + h_z)
        n = jnp.tanh(gin_ref[tt] + r * h_n)
        h_new = (1.0 - z) * n + z * h

        out_ref[tt] = h_new.astype(out_ref.dtype)
        return h_new

    h_final = jax.lax.fori_loop(0, chunk, step, h_scratch[...], unroll=True)
    h_scratch[...] = h_final


def auto_rnn_forward(x_bct, w_ih, w_hh, b_ih, b_hh, *, time_chunk=8):
    """AutoRNN.forward equivalent.

    x_bct : (B, C, T) float32   (matches torch input; C == input_size)
    w_ih  : (3H, C), w_hh : (3H, H), b_ih/b_hh : (3H,)   (torch.nn.GRU parameters)
    returns (B, H, T)
    """
    B, C, T = x_bct.shape
    H = w_hh.shape[1]

    # ---------------- Hoisted input projection (one big MXU matmul) ----------------
    x_tbc = jnp.transpose(x_bct, (2, 0, 1))                      # (T, B, C)
    x_flat = x_tbc.reshape(T * B, C).astype(jnp.bfloat16)        # (T*B, C)
    w_ih_t = jnp.transpose(w_ih).astype(jnp.bfloat16)            # (C, 3H)

    # Fold every h-independent bias into the hoisted projection:
    #   r/z gates: b_i* + b_h*   ;   n gate: only b_in (b_hn stays inside r*(...)).
    bias_fold = b_ih + jnp.concatenate(
        [b_hh[: 2 * H], jnp.zeros((H,), b_hh.dtype)])
    gi = jnp.dot(x_flat, w_ih_t, preferred_element_type=jnp.float32) + bias_fold
    gi = gi.reshape(T, B, 3 * H)                                 # fp32

    # ---------------- Time chunking ----------------
    TT = max(1, min(time_chunk, T))
    T_pad = ((T + TT - 1) // TT) * TT
    if T_pad != T:
        gi = jnp.pad(gi, ((0, T_pad - T), (0, 0), (0, 0)))
    num_chunks = T_pad // TT

    # Three separate per-gate tensors -> no unaligned lane slicing inside the kernel.
    gi_r = gi[:, :, 0:H]
    gi_z = gi[:, :, H:2 * H]
    gi_n = gi[:, :, 2 * H:3 * H]

    # Per-gate recurrent weights, pre-transposed, bf16 for the MXU.
    w_hr_t = jnp.transpose(w_hh[0:H]).astype(jnp.bfloat16)       # (H, H)
    w_hz_t = jnp.transpose(w_hh[H:2 * H]).astype(jnp.bfloat16)   # (H, H)
    w_hn_t = jnp.transpose(w_hh[2 * H:3 * H]).astype(jnp.bfloat16)
    b_hn = b_hh[2 * H:3 * H].reshape(1, H)                       # fp32

    kernel = functools.partial(gru_chunk_kernel, chunk=TT)

    y_tbh = pl.pallas_call(
        kernel,
        out_shape=jax.ShapeDtypeStruct((T_pad, B, H), jnp.float32),
        grid_spec=pltpu.PrefetchScalarGridSpec(
            num_scalar_prefetch=0,
            grid=(num_chunks,),
            in_specs=[
                pl.BlockSpec((TT, B, H), lambda i: (i, 0, 0)),   # gi_r chunk
                pl.BlockSpec((TT, B, H), lambda i: (i, 0, 0)),   # gi_z chunk
                pl.BlockSpec((TT, B, H), lambda i: (i, 0, 0)),   # gi_n chunk
                pl.BlockSpec((H, H), lambda i: (0, 0)),          # W_hr^T (bf16)
                pl.BlockSpec((H, H), lambda i: (0, 0)),          # W_hz^T (bf16)
                pl.BlockSpec((H, H), lambda i: (0, 0)),          # W_hn^T (bf16)
                pl.BlockSpec((1, H), lambda i: (0, 0)),          # b_hn
            ],
            out_specs=pl.BlockSpec((TT, B, H), lambda i: (i, 0, 0)),
            scratch_shapes=[pltpu.VMEM((B, H), jnp.float32)],    # carried hidden state
        ),
        compiler_params=pltpu.CompilerParams(
            # Time chunks are a true recurrence: sequential.
            dimension_semantics=("arbitrary",),
        ),
    )(gi_r, gi_z, gi_n, w_hr_t, w_hz_t, w_hn_t, b_hn)

    y_tbh = y_tbh[:T]
    # Glue: permute(1, 2, 0) -> (B, H, T), matching the module's output layout.
    return jnp.transpose(y_tbh, (1, 2, 0))


def _reference_gru(x_bct, w_ih, w_hh, b_ih, b_hh):
    """Pure-JAX reference (lax.scan) mirroring torch.nn.GRU semantics.

    Matmul operands are cast to bf16 (fp32 accumulation) to mirror the kernel's
    MXU precision; gate math and the hidden state stay fp32.
    """
    B, C, T = x_bct.shape
    H = w_hh.shape[1]
    x_tbc = jnp.transpose(x_bct, (2, 0, 1))
    w_ih_t = jnp.transpose(w_ih).astype(jnp.bfloat16)
    w_hh_t = jnp.transpose(w_hh).astype(jnp.bfloat16)

    def step(h, x_t):
        gi = jnp.dot(x_t.astype(jnp.bfloat16), w_ih_t,
                     preferred_element_type=jnp.float32) + b_ih
        gh = jnp.dot(h.astype(jnp.bfloat16), w_hh_t,
                     preferred_element_type=jnp.float32) + b_hh
        i_r, i_z, i_n = gi[:, :H], gi[:, H:2 * H], gi[:, 2 * H:]
        h_r, h_z, h_n = gh[:, :H], gh[:, H:2 * H], gh[:, 2 * H:]
        r = jax.nn.sigmoid(i_r + h_r)
        z = jax.nn.sigmoid(i_z + h_z)
        n = jnp.tanh(i_n + r * h_n)
        h_new = (1.0 - z) * n + z * h
        return h_new, h_new

    h0 = jnp.zeros((B, H), jnp.float32)
    _, ys = jax.lax.scan(step, h0, x_tbc)
    return jnp.transpose(ys, (1, 2, 0))


if __name__ == "__main__":
    # Small shapes consistent with the module: (batch, input_size, time).
    B, C, T, H = 2, 4, 16, 32   # T=16 with time_chunk=8 -> 2 sequential grid steps

    key = jax.random.PRNGKey(0)
    kx, k1, k2, k3, k4 = jax.random.split(key, 5)

    x = jax.random.normal(kx, (B, C, T), dtype=jnp.float32)

    # torch.nn.GRU parameter shapes:
    #   weight_ih_l0 (3H, C), weight_hh_l0 (3H, H), bias_ih_l0 (3H,), bias_hh_l0 (3H,)
    bound = 1.0 / math.sqrt(H)
    w_ih = jax.random.uniform(k1, (3 * H, C), jnp.float32, -bound, bound)
    w_hh = jax.random.uniform(k2, (3 * H, H), jnp.float32, -bound, bound)
    b_ih = jax.random.uniform(k3, (3 * H,), jnp.float32, -bound, bound)
    b_hh = jax.random.uniform(k4, (3 * H,), jnp.float32, -bound, bound)

    out = auto_rnn_forward(x, w_ih, w_hh, b_ih, b_hh, time_chunk=8)
    out = jax.block_until_ready(out)

    ref = _reference_gru(x, w_ih, w_hh, b_ih, b_hh)
    assert out.shape == (B, H, T), out.shape
    err = float(jnp.max(jnp.abs(out - ref)))
    assert jnp.allclose(out, ref, atol=1e-2, rtol=1e-2), err

    print("KERNEL_OK")
</pallas_src>

<mosaic_0001>
module attributes {stable_mosaic.version = 11 : i64} {
  func.func @gru_chunk_kernel(%arg0: i32, %arg1: memref<8x2x32xf32, #tpu.memory_space<vmem>>, %arg2: memref<8x2x32xf32, #tpu.memory_space<vmem>>, %arg3: memref<8x2x32xf32, #tpu.memory_space<vmem>>, %arg4: memref<32x32xbf16, #tpu.memory_space<vmem>>, %arg5: memref<32x32xbf16, #tpu.memory_space<vmem>>, %arg6: memref<32x32xbf16, #tpu.memory_space<vmem>>, %arg7: memref<1x32xf32, #tpu.memory_space<vmem>>, %arg8: memref<8x2x32xf32, #tpu.memory_space<vmem>>, %arg9: memref<2x32xf32, #tpu.memory_space<vmem>>) attributes {dimension_semantics = [#tpu.dimension_semantics<arbitrary>], iteration_bounds = array<i64: 2>, scalar_prefetch = 0 : i64, scratch_operands = 1 : i64, tpu.core_type = #tpu.core_type<tc>, window_params = [{transform_indices = @transform_0, window_bounds = array<i64: 8, 2, 32>}, {transform_indices = @transform_1, window_bounds = array<i64: 8, 2, 32>}, {transform_indices = @transform_2, window_bounds = array<i64: 8, 2, 32>}, {pipeline_mode = #tpu.pipeline_mode<synchronous>, transform_indices = @transform_3, window_bounds = array<i64: 32, 32>}, {pipeline_mode = #tpu.pipeline_mode<synchronous>, transform_indices = @transform_4, window_bounds = array<i64: 32, 32>}, {pipeline_mode = #tpu.pipeline_mode<synchronous>, transform_indices = @transform_5, window_bounds = array<i64: 32, 32>}, {pipeline_mode = #tpu.pipeline_mode<synchronous>, transform_indices = @transform_6, window_bounds = array<i64: 1, 32>}, {transform_indices = @transform_7, window_bounds = array<i64: 8, 2, 32>}]} {
    %c0_i32 = arith.constant 0 : i32
    %0 = arith.cmpi eq, %arg0, %c0_i32 : i32
    %1 = arith.extui %0 : i1 to i32
    %c0_i32_0 = arith.constant 0 : i32
    %2 = arith.cmpi ne, %1, %c0_i32_0 : i32
    scf.if %2 {
      %cst_124 = arith.constant 0.000000e+00 : f32
      %321 = vector.broadcast %cst_124 : f32 to vector<2x32xf32>
      %c0_125 = arith.constant 0 : index
      %c0_126 = arith.constant 0 : index
      %322 = vector.load %arg9[%c0_125, %c0_126] : memref<2x32xf32, #tpu.memory_space<vmem>>, vector<2x32xf32>
      tpu.vector_store %arg9[%c0_125, %c0_126], %321 {strides = array<i32>} : memref<2x32xf32, #tpu.memory_space<vmem>>, vector<2x32xf32>,
    } else {
    }
    %c0 = arith.constant 0 : index
    %c0_1 = arith.constant 0 : index
    %3 = vector.load %arg4[%c0, %c0_1] : memref<32x32xbf16, #tpu.memory_space<vmem>>, vector<32x32xbf16>
    %c0_2 = arith.constant 0 : index
    %c0_3 = arith.constant 0 : index
    %4 = vector.load %arg5[%c0_2, %c0_3] : memref<32x32xbf16, #tpu.memory_space<vmem>>, vector<32x32xbf16>
    %c0_4 = arith.constant 0 : index
    %c0_5 = arith.constant 0 : index
    %5 = vector.load %arg6[%c0_4, %c0_5] : memref<32x32xbf16, #tpu.memory_space<vmem>>, vector<32x32xbf16>
    %c0_6 = arith.constant 0 : index
    %c0_7 = arith.constant 0 : index
    %6 = vector.load %arg7[%c0_6, %c0_7] : memref<1x32xf32, #tpu.memory_space<vmem>>, vector<1x32xf32>
    %c0_8 = arith.constant 0 : index
    %c0_9 = arith.constant 0 : index
    %7 = vector.load %arg9[%c0_8, %c0_9] : memref<2x32xf32, #tpu.memory_space<vmem>>, vector<2x32xf32>
    %c0_i32_10 = arith.constant 0 : i32
    %8 = arith.truncf %7 : vector<2x32xf32> to vector<2x32xbf16>
    %cst = arith.constant dense<0.000000e+00> : vector<2x32xf32>
    %9 = tpu.matmul %8, %3, %cst {dimension_numbers = #tpu.dot_dimension_numbers<[1], [0], [0], [1], [0, 0, 1, 1], [], []>} : vector<2x32xbf16>, vector<32x32xbf16>, vector<2x32xf32> -> vector<2x32xf32>
    %cst_11 = arith.constant dense<0.000000e+00> : vector<2x32xf32>
    %10 = tpu.matmul %8, %4, %cst_11 {dimension_numbers = #tpu.dot_dimension_numbers<[1], [0], [0], [1], [0, 0, 1, 1], [], []>} : vector<2x32xbf16>, vector<32x32xbf16>, vector<2x32xf32> -> vector<2x32xf32>
    %cst_12 = arith.constant dense<0.000000e+00> : vector<2x32xf32>
    %11 = tpu.matmul %8, %5, %cst_12 {dimension_numbers = #tpu.dot_dimension_numbers<[1], [0], [0], [1], [0, 0, 1, 1], [], []>} : vector<2x32xbf16>, vector<32x32xbf16>, vector<2x32xf32> -> vector<2x32xf32>
    %12 = vector.broadcast %6 : vector<1x32xf32> to vector<2x32xf32>
    %13 = arith.addf %11, %12 : vector<2x32xf32>
    %14 = arith.index_cast %c0_i32_10 : i32 to index
    %c0_13 = arith.constant 0 : index
    %c0_14 = arith.constant 0 : index
    %15 = vector.load %arg1[%14, %c0_13, %c0_14] : memref<8x2x32xf32, #tpu.memory_space<vmem>>, vector<1x2x32xf32>
    %16 = vector.shape_cast %15 : vector<1x2x32xf32> to vector<2x32xf32>
    %17 = arith.addf %16, %9 : vector<2x32xf32>
    %18 = arith.negf %17 : vector<2x32xf32>
    %19 = math.exp %18 : vector<2x32xf32>
    %cst_15 = arith.constant 1.000000e+00 : f32
    %20 = vector.broadcast %cst_15 : f32 to vector<2x32xf32>
    %21 = arith.addf %20, %19 : vector<2x32xf32>
    %22 = arith.divf %20, %21 : vector<2x32xf32>
    %23 = arith.index_cast %c0_i32_10 : i32 to index
    %c0_16 = arith.constant 0 : index
    %c0_17 = arith.constant 0 : index
    %24 = vector.load %arg2[%23, %c0_16, %c0_17] : memref<8x2x32xf32, #tpu.memory_space<vmem>>, vector<1x2x32xf32>
    %25 = vector.shape_cast %24 : vector<1x2x32xf32> to vector<2x32xf32>
    %26 = arith.addf %25, %10 : vector<2x32xf32>
    %27 = arith.negf %26 : vector<2x32xf32>
    %28 = math.exp %27 : vector<2x32xf32>
    %cst_18 = arith.constant 1.000000e+00 : f32
    %29 = vector.broadcast %cst_18 : f32 to vector<2x32xf32>
    %30 = arith.addf %29, %28 : vector<2x32xf32>
    %31 = arith.divf %29, %30 : vector<2x32xf32>
    %32 = arith.index_cast %c0_i32_10 : i32 to index
    %c0_19 = arith.constant 0 : index
    %c0_20 = arith.constant 0 : index
    %33 = vector.load %arg3[%32, %c0_19, %c0_20] : memref<8x2x32xf32, #tpu.memory_space<vmem>>, vector<1x2x32xf32>
    %34 = vector.shape_cast %33 : vector<1x2x32xf32> to vector<2x32xf32>
    %35 = arith.mulf %22, %13 : vector<2x32xf32>
    %36 = arith.addf %34, %35 : vector<2x32xf32>
    %37 = math.tanh %36 : vector<2x32xf32>
    %cst_21 = arith.constant 1.000000e+00 : f32
    %38 = vector.broadcast %cst_21 : f32 to vector<2x32xf32>
    %39 = arith.subf %38, %31 : vector<2x32xf32>
    %40 = arith.mulf %39, %37 : vector<2x32xf32>
    %41 = arith.mulf %31, %7 : vector<2x32xf32>
    %42 = arith.addf %40, %41 : vector<2x32xf32>
    %43 = arith.index_cast %c0_i32_10 : i32 to index
    %c0_22 = arith.constant 0 : index
    %c0_23 = arith.constant 0 : index
    %44 = vector.load %arg8[%43, %c0_22, %c0_23] : memref<8x2x32xf32, #tpu.memory_space<vmem>>, vector<1x2x32xf32>
    %45 = vector.shape_cast %44 : vector<1x2x32xf32> to vector<2x32xf32>
    %46 = vector.shape_cast %42 : vector<2x32xf32> to vector<1x2x32xf32>
    tpu.vector_store %arg8[%43, %c0_22, %c0_23], %46 {strides = array<i32>} : memref<8x2x32xf32, #tpu.memory_space<vmem>>, vector<1x2x32xf32>,
    %c1_i32 = arith.constant 1 : i32
    %47 = arith.truncf %42 : vector<2x32xf32> to vector<2x32xbf16>
    %cst_24 = arith.constant dense<0.000000e+00> : vector<2x32xf32>
    %48 = tpu.matmul %47, %3, %cst_24 {dimension_numbers = #tpu.dot_dimension_numbers<[1], [0], [0], [1], [0, 0, 1, 1], [], []>} : vector<2x32xbf16>, vector<32x32xbf16>, vector<2x32xf32> -> vector<2x32xf32>
    %cst_25 = arith.constant dense<0.000000e+00> : vector<2x32xf32>
    %49 = tpu.matmul %47, %4, %cst_25 {dimension_numbers = #tpu.dot_dimension_numbers<[1], [0], [0], [1], [0, 0, 1, 1], [], []>} : vector<2x32xbf16>, vector<32x32xbf16>, vector<2x32xf32> -> vector<2x32xf32>
    %cst_26 = arith.constant dense<0.000000e+00> : vector<2x32xf32>
    %50 = tpu.matmul %47, %5, %cst_26 {dimension_numbers = #tpu.dot_dimension_numbers<[1], [0], [0], [1], [0, 0, 1, 1], [], []>} : vector<2x32xbf16>, vector<32x32xbf16>, vector<2x32xf32> -> vector<2x32xf32>
    %51 = vector.broadcast %6 : vector<1x32xf32> to vector<2x32xf32>
    %52 = arith.addf %50, %51 : vector<2x32xf32>
    %53 = arith.index_cast %c1_i32 : i32 to index
    %c0_27 = arith.constant 0 : index
    %c0_28 = arith.constant 0 : index
    %54 = vector.load %arg1[%53, %c0_27, %c0_28] : memref<8x2x32xf32, #tpu.memory_space<vmem>>, vector<1x2x32xf32>
    %55 = vector.shape_cast %54 : vector<1x2x32xf32> to vector<2x32xf32>
    %56 = arith.addf %55, %48 : vector<2x32xf32>
    %57 = arith.negf %56 : vector<2x32xf32>
    %58 = math.exp %57 : vector<2x32xf32>
    %cst_29 = arith.constant 1.000000e+00 : f32
    %59 = vector.broadcast %cst_29 : f32 to vector<2x32xf32>
    %60 = arith.addf %59, %58 : vector<2x32xf32>
    %61 = arith.divf %59, %60 : vector<2x32xf32>
    %62 = arith.index_cast %c1_i32 : i32 to index
    %c0_30 = arith.constant 0 : index
    %c0_31 = arith.constant 0 : index
    %63 = vector.load %arg2[%62, %c0_30, %c0_31] : memref<8x2x32xf32, #tpu.memory_space<vmem>>, vector<1x2x32xf32>
    %64 = vector.shape_cast %63 : vector<1x2x32xf32> to vector<2x32xf32>
    %65 = arith.addf %64, %49 : vector<2x32xf32>
    %66 = arith.negf %65 : vector<2x32xf32>
    %67 = math.exp %66 : vector<2x32xf32>
    %cst_32 = arith.constant 1.000000e+00 : f32
    %68 = vector.broadcast %cst_32 : f32 to vector<2x32xf32>
    %69 = arith.addf %68, %67 : vector<2x32xf32>
    %70 = arith.divf %68, %69 : vector<2x32xf32>
    %71 = arith.index_cast %c1_i32 : i32 to index
    %c0_33 = arith.constant 0 : index
    %c0_34 = arith.constant 0 : index
    %72 = vector.load %arg3[%71, %c0_33, %c0_34] : memref<8x2x32xf32, #tpu.memory_space<vmem>>, vector<1x2x32xf32>
    %73 = vector.shape_cast %72 : vector<1x2x32xf32> to vector<2x32xf32>
    %74 = arith.mulf %61, %52 : vector<2x32xf32>
    %75 = arith.addf %73, %74 : vector<2x32xf32>
    %76 = math.tanh %75 : vector<2x32xf32>
    %cst_35 = arith.constant 1.000000e+00 : f32
    %77 = vector.broadcast %cst_35 : f32 to vector<2x32xf32>
    %78 = arith.subf %77, %70 : vector<2x32xf32>
    %79 = arith.mulf %78, %76 : vector<2x32xf32>
    %80 = arith.mulf %70, %42 : vector<2x32xf32>
    %81 = arith.addf %79, %80 : vector<2x32xf32>
    %82 = arith.index_cast %c1_i32 : i32 to index
    %c0_36 = arith.constant 0 : index
    %c0_37 = arith.constant 0 : index
    %83 = vector.load %arg8[%82, %c0_36, %c0_37] : memref<8x2x32xf32, #tpu.memory_space<vmem>>, vector<1x2x32xf32>
    %84 = vector.shape_cast %83 : vector<1x2x32xf32> to vector<2x32xf32>
    %85 = vector.shape_cast %81 : vector<2x32xf32> to vector<1x2x32xf32>
    tpu.vector_store %arg8[%82, %c0_36, %c0_37], %85 {strides = array<i32>} : memref<8x2x32xf32, #tpu.memory_space<vmem>>, vector<1x2x32xf32>,
    %c2_i32 = arith.constant 2 : i32
    %86 = arith.truncf %81 : vector<2x32xf32> to vector<2x32xbf16>
    %cst_38 = arith.constant dense<0.000000e+00> : vector<2x32xf32>
    %87 = tpu.matmul %86, %3, %cst_38 {dimension_numbers = #tpu.dot_dimension_numbers<[1], [0], [0], [1], [0, 0, 1, 1], [], []>} : vector<2x32xbf16>, vector<32x32xbf16>, vector<2x32xf32> -> vector<2x32xf32>
    %cst_39 = arith.constant dense<0.000000e+00> : vector<2x32xf32>
    %88 = tpu.matmul %86, %4, %cst_39 {dimension_numbers = #tpu.dot_dimension_numbers<[1], [0], [0], [1], [0, 0, 1, 1], [], []>} : vector<2x32xbf16>, vector<32x32xbf16>, vector<2x32xf32> -> vector<2x32xf32>
    %cst_40 = arith.constant dense<0.000000e+00> : vector<2x32xf32>
    %89 = tpu.matmul %86, %5, %cst_40 {dimension_numbers = #tpu.dot_dimension_numbers<[1], [0], [0], [1], [0, 0, 1, 1], [], []>} : vector<2x32xbf16>, vector<32x32xbf16>, vector<2x32xf32> -> vector<2x32xf32>
    %90 = vector.broadcast %6 : vector<1x32xf32> to vector<2x32xf32>
    %91 = arith.addf %89, %90 : vector<2x32xf32>
    %92 = arith.index_cast %c2_i32 : i32 to index
    %c0_41 = arith.constant 0 : index
    %c0_42 = arith.constant 0 : index
    %93 = vector.load %arg1[%92, %c0_41, %c0_42] : memref<8x2x32xf32, #tpu.memory_space<vmem>>, vector<1x2x32xf32>
    %94 = vector.shape_cast %93 : vector<1x2x32xf32> to vector<2x32xf32>
    %95 = arith.addf %94, %87 : vector<2x32xf32>
    %96 = arith.negf %95 : vector<2x32xf32>
    %97 = math.exp %96 : vector<2x32xf32>
    %cst_43 = arith.constant 1.000000e+00 : f32
    %98 = vector.broadcast %cst_43 : f32 to vector<2x32xf32>
    %99 = arith.addf %98, %97 : vector<2x32xf32>
    %100 = arith.divf %98, %99 : vector<2x32xf32>
    %101 = arith.index_cast %c2_i32 : i32 to index
    %c0_44 = arith.constant 0 : index
    %c0_45 = arith.constant 0 : index
    %102 = vector.load %arg2[%101, %c0_44, %c0_45] : memref<8x2x32xf32, #tpu.memory_space<vmem>>, vector<1x2x32xf32>
    %103 = vector.shape_cast %102 : vector<1x2x32xf32> to vector<2x32xf32>
    %104 = arith.addf %103, %88 : vector<2x32xf32>
    %105 = arith.negf %104 : vector<2x32xf32>
    %106 = math.exp %105 : vector<2x32xf32>
    %cst_46 = arith.constant 1.000000e+00 : f32
    %107 = vector.broadcast %cst_46 : f32 to vector<2x32xf32>
    %108 = arith.addf %107, %106 : vector<2x32xf32>
    %109 = arith.divf %107, %108 : vector<2x32xf32>
    %110 = arith.index_cast %c2_i32 : i32 to index
    %c0_47 = arith.constant 0 : index
    %c0_48 = arith.constant 0 : index
    %111 = vector.load %arg3[%110, %c0_47, %c0_48] : memref<8x2x32xf32, #tpu.memory_space<vmem>>, vector<1x2x32xf32>
    %112 = vector.shape_cast %111 : vector<1x2x32xf32> to vector<2x32xf32>
    %113 = arith.mulf %100, %91 : vector<2x32xf32>
    %114 = arith.addf %112, %113 : vector<2x32xf32>
    %115 = math.tanh %114 : vector<2x32xf32>
    %cst_49 = arith.constant 1.000000e+00 : f32
    %116 = vector.broadcast %cst_49 : f32 to vector<2x32xf32>
    %117 = arith.subf %116, %109 : vector<2x32xf32>
    %118 = arith.mulf %117, %115 : vector<2x32xf32>
    %119 = arith.mulf %109, %81 : vector<2x32xf32>
    %120 = arith.addf %118, %119 : vector<2x32xf32>
    %121 = arith.index_cast %c2_i32 : i32 to index
    %c0_50 = arith.constant 0 : index
    %c0_51 = arith.constant 0 : index
    %122 = vector.load %arg8[%121, %c0_50, %c0_51] : memref<8x2x32xf32, #tpu.memory_space<vmem>>, vector<1x2x32xf32>
    %123 = vector.shape_cast %122 : vector<1x2x32xf32> to vector<2x32xf32>
    %124 = vector.shape_cast %120 : vector<2x32xf32> to vector<1x2x32xf32>
    tpu.vector_store %arg8[%121, %c0_50, %c0_51], %124 {strides = array<i32>} : memref<8x2x32xf32, #tpu.memory_space<vmem>>, vector<1x2x32xf32>,
    %c3_i32 = arith.constant 3 : i32
    %125 = arith.truncf %120 : vector<2x32xf32> to vector<2x32xbf16>
    %cst_52 = arith.constant dense<0.000000e+00> : vector<2x32xf32>
    %126 = tpu.matmul %125, %3, %cst_52 {dimension_numbers = #tpu.dot_dimension_numbers<[1], [0], [0], [1], [0, 0, 1, 1], [], []>} : vector<2x32xbf16>, vector<32x32xbf16>, vector<2x32xf32> -> vector<2x32xf32>
    %cst_53 = arith.constant dense<0.000000e+00> : vector<2x32xf32>
    %127 = tpu.matmul %125, %4, %cst_53 {dimension_numbers = #tpu.dot_dimension_numbers<[1], [0], [0], [1], [0, 0, 1, 1], [], []>} : vector<2x32xbf16>, vector<32x32xbf16>, vector<2x32xf32> -> vector<2x32xf32>
    %cst_54 = arith.constant dense<0.000000e+00> : vector<2x32xf32>
    %128 = tpu.matmul %125, %5, %cst_54 {dimension_numbers = #tpu.dot_dimension_numbers<[1], [0], [0], [1], [0, 0, 1, 1], [], []>} : vector<2x32xbf16>, vector<32x32xbf16>, vector<2x32xf32> -> vector<2x32xf32>
    %129 = vector.broadcast %6 : vector<1x32xf32> to vector<2x32xf32>
    %130 = arith.addf %128, %129 : vector<2x32xf32>
    %131 = arith.index_cast %c3_i32 : i32 to index
    %c0_55 = arith.constant 0 : index
    %c0_56 = arith.constant 0 : index
    %132 = vector.load %arg1[%131, %c0_55, %c0_56] : memref<8x2x32xf32, #tpu.memory_space<vmem>>, vector<1x2x32xf32>
    %133 = vector.shape_cast %132 : vector<1x2x32xf32> to vector<2x32xf32>
    %134 = arith.addf %133, %126 : vector<2x32xf32>
    %135 = arith.negf %134 : vector<2x32xf32>
    %136 = math.exp %135 : vector<2x32xf32>
    %cst_57 = arith.constant 1.000000e+00 : f32
    %137 = vector.broadcast %cst_57 : f32 to vector<2x32xf32>
    %138 = arith.addf %137, %136 : vector<2x32xf32>
    %139 = arith.divf %137, %138 : vector<2x32xf32>
    %140 = arith.index_cast %c3_i32 : i32 to index
    %c0_58 = arith.constant 0 : index
    %c0_59 = arith.constant 0 : index
    %141 = vector.load %arg2[%140, %c0_58, %c0_59] : memref<8x2x32xf32, #tpu.memory_space<vmem>>, vector<1x2x32xf32>
    %142 = vector.shape_cast %141 : vector<1x2x32xf32> to vector<2x32xf32>
    %143 = arith.addf %142, %127 : vector<2x32xf32>
    %144 = arith.negf %143 : vector<2x32xf32>
    %145 = math.exp %144 : vector<2x32xf32>
    %cst_60 = arith.constant 1.000000e+00 : f32
    %146 = vector.broadcast %cst_60 : f32 to vector<2x32xf32>
    %147 = arith.addf %146, %145 : vector<2x32xf32>
    %148 = arith.divf %146, %147 : vector<2x32xf32>
    %149 = arith.index_cast %c3_i32 : i32 to index
    %c0_61 = arith.constant 0 : index
    %c0_62 = arith.constant 0 : index
    %150 = vector.load %arg3[%149, %c0_61, %c0_62] : memref<8x2x32xf32, #tpu.memory_space<vmem>>, vector<1x2x32xf32>
    %151 = vector.shape_cast %150 : vector<1x2x32xf32> to vector<2x32xf32>
    %152 = arith.mulf %139, %130 : vector<2x32xf32>
    %153 = arith.addf %151, %152 : vector<2x32xf32>
    %154 = math.tanh %153 : vector<2x32xf32>
    %cst_63 = arith.constant 1.000000e+00 : f32
    %155 = vector.broadcast %cst_63 : f32 to vector<2x32xf32>
    %156 = arith.subf %155, %148 : vector<2x32xf32>
    %157 = arith.mulf %156, %154 : vector<2x32xf32>
    %158 = arith.mulf %148, %120 : vector<2x32xf32>
    %159 = arith.addf %157, %158 : vector<2x32xf32>
    %160 = arith.index_cast %c3_i32 : i32 to index
    %c0_64 = arith.constant 0 : index
    %c0_65 = arith.constant 0 : index
    %161 = vector.load %arg8[%160, %c0_64, %c0_65] : memref<8x2x32xf32, #tpu.memory_space<vmem>>, vector<1x2x32xf32>
    %162 = vector.shape_cast %161 : vector<1x2x32xf32> to vector<2x32xf32>
    %163 = vector.shape_cast %159 : vector<2x32xf32> to vector<1x2x32xf32>
    tpu.vector_store %arg8[%160, %c0_64, %c0_65], %163 {strides = array<i32>} : memref<8x2x32xf32, #tpu.memory_space<vmem>>, vector<1x2x32xf32>,
    %c4_i32 = arith.constant 4 : i32
    %164 = arith.truncf %159 : vector<2x32xf32> to vector<2x32xbf16>
    %cst_66 = arith.constant dense<0.000000e+00> : vector<2x32xf32>
    %165 = tpu.matmul %164, %3, %cst_66 {dimension_numbers = #tpu.dot_dimension_numbers<[1], [0], [0], [1], [0, 0, 1, 1], [], []>} : vector<2x32xbf16>, vector<32x32xbf16>, vector<2x32xf32> -> vector<2x32xf32>
    %cst_67 = arith.constant dense<0.000000e+00> : vector<2x32xf32>
    %166 = tpu.matmul %164, %4, %cst_67 {dimension_numbers = #tpu.dot_dimension_numbers<[1], [0], [0], [1], [0, 0, 1, 1], [], []>} : vector<2x32xbf16>, vector<32x32xbf16>, vector<2x32xf32> -> vector<2x32xf32>
    %cst_68 = arith.constant dense<0.000000e+00> : vector<2x32xf32>
    %167 = tpu.matmul %164, %5, %cst_68 {dimension_numbers = #tpu.dot_dimension_numbers<[1], [0], [0], [1], [0, 0, 1, 1], [], []>} : vector<2x32xbf16>, vector<32x32xbf16>, vector<2x32xf32> -> vector<2x32xf32>
    %168 = vector.broadcast %6 : vector<1x32xf32> to vector<2x32xf32>
    %169 = arith.addf %167, %168 : vector<2x32xf32>
    %170 = arith.index_cast %c4_i32 : i32 to index
    %c0_69 = arith.constant 0 : index
    %c0_70 = arith.constant 0 : index
    %171 = vector.load %arg1[%170, %c0_69, %c0_70] : memref<8x2x32xf32, #tpu.memory_space<vmem>>, vector<1x2x32xf32>
    %172 = vector.shape_cast %171 : vector<1x2x32xf32> to vector<2x32xf32>
    %173 = arith.addf %172, %165 : vector<2x32xf32>
    %174 = arith.negf %173 : vector<2x32xf32>
    %175 = math.exp %174 : vector<2x32xf32>
    %cst_71 = arith.constant 1.000000e+00 : f32
    %176 = vector.broadcast %cst_71 : f32 to vector<2x32xf32>
    %177 = arith.addf %176, %175 : vector<2x32xf32>
    %178 = arith.divf %176, %177 : vector<2x32xf32>
    %179 = arith.index_cast %c4_i32 : i32 to index
    %c0_72 = arith.constant 0 : index
    %c0_73 = arith.constant 0 : index
    %180 = vector.load %arg2[%179, %c0_72, %c0_73] : memref<8x2x32xf32, #tpu.memory_space<vmem>>, vector<1x2x32xf32>
    %181 = vector.shape_cast %180 : vector<1x2x32xf32> to vector<2x32xf32>
    %182 = arith.addf %181, %166 : vector<2x32xf32>
    %183 = arith.negf %182 : vector<2x32xf32>
    %184 = math.exp %183 : vector<2x32xf32>
    %cst_74 = arith.constant 1.000000e+00 : f32
    %185 = vector.broadcast %cst_74 : f32 to vector<2x32xf32>
    %186 = arith.addf %185, %184 : vector<2x32xf32>
    %187 = arith.divf %185, %186 : vector<2x32xf32>
    %188 = arith.index_cast %c4_i32 : i32 to index
    %c0_75 = arith.constant 0 : index
    %c0_76 = arith.constant 0 : index
    %189 = vector.load %arg3[%188, %c0_75, %c0_76] : memref<8x2x32xf32, #tpu.memory_space<vmem>>, vector<1x2x32xf32>
    %190 = vector.shape_cast %189 : vector<1x2x32xf32> to vector<2x32xf32>
    %191 = arith.mulf %178, %169 : vector<2x32xf32>
    %192 = arith.addf %190, %191 : vector<2x32xf32>
    %193 = math.tanh %192 : vector<2x32xf32>
    %cst_77 = arith.constant 1.000000e+00 : f32
    %194 = vector.broadcast %cst_77 : f32 to vector<2x32xf32>
    %195 = arith.subf %194, %187 : vector<2x32xf32>
    %196 = arith.mulf %195, %193 : vector<2x32xf32>
    %197 = arith.mulf %187, %159 : vector<2x32xf32>
    %198 = arith.addf %196, %197 : vector<2x32xf32>
    %199 = arith.index_cast %c4_i32 : i32 to index
    %c0_78 = arith.constant 0 : index
    %c0_79 = arith.constant 0 : index
    %200 = vector.load %arg8[%199, %c0_78, %c0_79] : memref<8x2x32xf32, #tpu.memory_space<vmem>>, vector<1x2x32xf32>
    %201 = vector.shape_cast %200 : vector<1x2x32xf32> to vector<2x32xf32>
    %202 = vector.shape_cast %198 : vector<2x32xf32> to vector<1x2x32xf32>
    tpu.vector_store %arg8[%199, %c0_78, %c0_79], %202 {strides = array<i32>} : memref<8x2x32xf32, #tpu.memory_space<vmem>>, vector<1x2x32xf32>,
    %c5_i32 = arith.constant 5 : i32
    %203 = arith.truncf %198 : vector<2x32xf32> to vector<2x32xbf16>
    %cst_80 = arith.constant dense<0.000000e+00> : vector<2x32xf32>
    %204 = tpu.matmul %203, %3, %cst_80 {dimension_numbers = #tpu.dot_dimension_numbers<[1], [0], [0], [1], [0, 0, 1, 1], [], []>} : vector<2x32xbf16>, vector<32x32xbf16>, vector<2x32xf32> -> vector<2x32xf32>
    %cst_81 = arith.constant dense<0.000000e+00> : vector<2x32xf32>
    %205 = tpu.matmul %203, %4, %cst_81 {dimension_numbers = #tpu.dot_dimension_numbers<[1], [0], [0], [1], [0, 0, 1, 1], [], []>} : vector<2x32xbf16>, vector<32x32xbf16>, vector<2x32xf32> -> vector<2x32xf32>
    %cst_82 = arith.constant dense<0.000000e+00> : vector<2x32xf32>
    %206 = tpu.matmul %203, %5, %cst_82 {dimension_numbers = #tpu.dot_dimension_numbers<[1], [0], [0], [1], [0, 0, 1, 1], [], []>} : vector<2x32xbf16>, vector<32x32xbf16>, vector<2x32xf32> -> vector<2x32xf32>
    %207 = vector.broadcast %6 : vector<1x32xf32> to vector<2x32xf32>
    %208 = arith.addf %206, %207 : vector<2x32xf32>
    %209 = arith.index_cast %c5_i32 : i32 to index
    %c0_83 = arith.constant 0 : index
    %c0_84 = arith.constant 0 : index
    %210 = vector.load %arg1[%209, %c0_83, %c0_84] : memref<8x2x32xf32, #tpu.memory_space<vmem>>, vector<1x2x32xf32>
    %211 = vector.shape_cast %210 : vector<1x2x32xf32> to vector<2x32xf32>
    %212 = arith.addf %211, %204 : vector<2x32xf32>
    %213 = arith.negf %212 : vector<2x32xf32>
    %214 = math.exp %213 : vector<2x32xf32>
    %cst_85 = arith.constant 1.000000e+00 : f32
    %215 = vector.broadcast %cst_85 : f32 to vector<2x32xf32>
    %216 = arith.addf %215, %214 : vector<2x32xf32>
    %217 = arith.divf %215, %216 : vector<2x32xf32>
    %218 = arith.index_cast %c5_i32 : i32 to index
    %c0_86 = arith.constant 0 : index
    %c0_87 = arith.constant 0 : index
    %219 = vector.load %arg2[%218, %c0_86, %c0_87] : memref<8x2x32xf32, #tpu.memory_space<vmem>>, vector<1x2x32xf32>
    %220 = vector.shape_cast %219 : vector<1x2x32xf32> to vector<2x32xf32>
    %221 = arith.addf %220, %205 : vector<2x32xf32>
    %222 = arith.negf %221 : vector<2x32xf32>
    %223 = math.exp %222 : vector<2x32xf32>
    %cst_88 = arith.constant 1.000000e+00 : f32
    %224 = vector.broadcast %cst_88 : f32 to vector<2x32xf32>
    %225 = arith.addf %224, %223 : vector<2x32xf32>
    %226 = arith.divf %224, %225 : vector<2x32xf32>
    %227 = arith.index_cast %c5_i32 : i32 to index
    %c0_89 = arith.constant 0 : index
    %c0_90 = arith.constant 0 : index
    %228 = vector.load %arg3[%227, %c0_89, %c0_90] : memref<8x2x32xf32, #tpu.memory_space<vmem>>, vector<1x2x32xf32>
    %229 = vector.shape_cast %228 : vector<1x2x32xf32> to vector<2x32xf32>
    %230 = arith.mulf %217, %208 : vector<2x32xf32>
    %231 = arith.addf %229, %230 : vector<2x32xf32>
    %232 = math.tanh %231 : vector<2x32xf32>
    %cst_91 = arith.constant 1.000000e+00 : f32
    %233 = vector.broadcast %cst_91 : f32 to vector<2x32xf32>
    %234 = arith.subf %233, %226 : vector<2x32xf32>
    %235 = arith.mulf %234, %232 : vector<2x32xf32>
    %236 = arith.mulf %226, %198 : vector<2x32xf32>
    %237 = arith.addf %235, %236 : vector<2x32xf32>
    %238 = arith.index_cast %c5_i32 : i32 to index
    %c0_92 = arith.constant 0 : index
    %c0_93 = arith.constant 0 : index
    %239 = vector.load %arg8[%238, %c0_92, %c0_93] : memref<8x2x32xf32, #tpu.memory_space<vmem>>, vector<1x2x32xf32>
    %240 = vector.shape_cast %239 : vector<1x2x32xf32> to vector<2x32xf32>
    %241 = vector.shape_cast %237 : vector<2x32xf32> to vector<1x2x32xf32>
    tpu.vector_store %arg8[%238, %c0_92, %c0_93], %241 {strides = array<i32>} : memref<8x2x32xf32, #tpu.memory_space<vmem>>, vector<1x2x32xf32>,
    %c6_i32 = arith.constant 6 : i32
    %242 = arith.truncf %237 : vector<2x32xf32> to vector<2x32xbf16>
    %cst_94 = arith.constant dense<0.000000e+00> : vector<2x32xf32>
    %243 = tpu.matmul %242, %3, %cst_94 {dimension_numbers = #tpu.dot_dimension_numbers<[1], [0], [0], [1], [0, 0, 1, 1], [], []>} : vector<2x32xbf16>, vector<32x32xbf16>, vector<2x32xf32> -> vector<2x32xf32>
    %cst_95 = arith.constant dense<0.000000e+00> : vector<2x32xf32>
    %244 = tpu.matmul %242, %4, %cst_95 {dimension_numbers = #tpu.dot_dimension_numbers<[1], [0], [0], [1], [0, 0, 1, 1], [], []>} : vector<2x32xbf16>, vector<32x32xbf16>, vector<2x32xf32> -> vector<2x32xf32>
    %cst_96 = arith.constant dense<0.000000e+00> : vector<2x32xf32>
    %245 = tpu.matmul %242, %5, %cst_96 {dimension_numbers = #tpu.dot_dimension_numbers<[1], [0], [0], [1], [0, 0, 1, 1], [], []>} : vector<2x32xbf16>, vector<32x32xbf16>, vector<2x32xf32> -> vector<2x32xf32>
    %246 = vector.broadcast %6 : vector<1x32xf32> to vector<2x32xf32>
    %247 = arith.addf %245, %246 : vector<2x32xf32>
    %248 = arith.index_cast %c6_i32 : i32 to index
    %c0_97 = arith.constant 0 : index
    %c0_98 = arith.constant 0 : index
    %249 = vector.load %arg1[%248, %c0_97, %c0_98] : memref<8x2x32xf32, #tpu.memory_space<vmem>>, vector<1x2x32xf32>
    %250 = vector.shape_cast %249 : vector<1x2x32xf32> to vector<2x32xf32>
    %251 = arith.addf %250, %243 : vector<2x32xf32>
    %252 = arith.negf %251 : vector<2x32xf32>
    %253 = math.exp %252 : vector<2x32xf32>
    %cst_99 = arith.constant 1.000000e+00 : f32
    %254 = vector.broadcast %cst_99 : f32 to vector<2x32xf32>
    %255 = arith.addf %254, %253 : vector<2x32xf32>
    %256 = arith.divf %254, %255 : vector<2x32xf32>
    %257 = arith.index_cast %c6_i32 : i32 to index
    %c0_100 = arith.constant 0 : index
    %c0_101 = arith.constant 0 : index
    %258 = vector.load %arg2[%257, %c0_100, %c0_101] : memref<8x2x32xf32, #tpu.memory_space<vmem>>, vector<1x2x32xf32>
    %259 = vector.shape_cast %258 : vector<1x2x32xf32> to vector<2x32xf32>
    %260 = arith.addf %259, %244 : vector<2x32xf32>
    %261 = arith.negf %260 : vector<2x32xf32>
    %262 = math.exp %261 : vector<2x32xf32>
    %cst_102 = arith.constant 1.000000e+00 : f32
    %263 = vector.broadcast %cst_102 : f32 to vector<2x32xf32>
    %264 = arith.addf %263, %262 : vector<2x32xf32>
    %265 = arith.divf %263, %264 : vector<2x32xf32>
    %266 = arith.index_cast %c6_i32 : i32 to index
    %c0_103 = arith.constant 0 : index
    %c0_104 = arith.constant 0 : index
    %267 = vector.load %arg3[%266, %c0_103, %c0_104] : memref<8x2x32xf32, #tpu.memory_space<vmem>>, vector<1x2x32xf32>
    %268 = vector.shape_cast %267 : vector<1x2x32xf32> to vector<2x32xf32>
    %269 = arith.mulf %256, %247 : vector<2x32xf32>
    %270 = arith.addf %268, %269 : vector<2x32xf32>
    %271 = math.tanh %270 : vector<2x32xf32>
    %cst_105 = arith.constant 1.000000e+00 : f32
    %272 = vector.broadcast %cst_105 : f32 to vector<2x32xf32>
    %273 = arith.subf %272, %265 : vector<2x32xf32>
    %274 = arith.mulf %273, %271 : vector<2x32xf32>
    %275 = arith.mulf %265, %237 : vector<2x32xf32>
    %276 = arith.addf %274, %275 : vector<2x32xf32>
    %277 = arith.index_cast %c6_i32 : i32 to index
    %c0_106 = arith.constant 0 : index
    %c0_107 = arith.constant 0 : index
    %278 = vector.load %arg8[%277, %c0_106, %c0_107] : memref<8x2x32xf32, #tpu.memory_space<vmem>>, vector<1x2x32xf32>
    %279 = vector.shape_cast %278 : vector<1x2x32xf32> to vector<2x32xf32>
    %280 = vector.shape_cast %276 : vector<2x32xf32> to vector<1x2x32xf32>
    tpu.vector_store %arg8[%277, %c0_106, %c0_107], %280 {strides = array<i32>} : memref<8x2x32xf32, #tpu.memory_space<vmem>>, vector<1x2x32xf32>,
    %c7_i32 = arith.constant 7 : i32
    %281 = arith.truncf %276 : vector<2x32xf32> to vector<2x32xbf16>
    %cst_108 = arith.constant dense<0.000000e+00> : vector<2x32xf32>
    %282 = tpu.matmul %281, %3, %cst_108 {dimension_numbers = #tpu.dot_dimension_numbers<[1], [0], [0], [1], [0, 0, 1, 1], [], []>} : vector<2x32xbf16>, vector<32x32xbf16>, vector<2x32xf32> -> vector<2x32xf32>
    %cst_109 = arith.constant dense<0.000000e+00> : vector<2x32xf32>
    %283 = tpu.matmul %281, %4, %cst_109 {dimension_numbers = #tpu.dot_dimension_numbers<[1], [0], [0], [1], [0, 0, 1, 1], [], []>} : vector<2x32xbf16>, vector<32x32xbf16>, vector<2x32xf32> -> vector<2x32xf32>
    %cst_110 = arith.constant dense<0.000000e+00> : vector<2x32xf32>
    %284 = tpu.matmul %281, %5, %cst_110 {dimension_numbers = #tpu.dot_dimension_numbers<[1], [0], [0], [1], [0, 0, 1, 1], [], []>} : vector<2x32xbf16>, vector<32x32xbf16>, vector<2x32xf32> -> vector<2x32xf32>
    %285 = vector.broadcast %6 : vector<1x32xf32> to vector<2x32xf32>
    %286 = arith.addf %284, %285 : vector<2x32xf32>
    %287 = arith.index_cast %c7_i32 : i32 to index
    %c0_111 = arith.constant 0 : index
    %c0_112 = arith.constant 0 : index
    %288 = vector.load %arg1[%287, %c0_111, %c0_112] : memref<8x2x32xf32, #tpu.memory_space<vmem>>, vector<1x2x32xf32>
    %289 = vector.shape_cast %288 : vector<1x2x32xf32> to vector<2x32xf32>
    %290 = arith.addf %289, %282 : vector<2x32xf32>
    %291 = arith.negf %290 : vector<2x32xf32>
    %292 = math.exp %291 : vector<2x32xf32>
    %cst_113 = arith.constant 1.000000e+00 : f32
    %293 = vector.broadcast %cst_113 : f32 to vector<2x32xf32>
    %294 = arith.addf %293, %292 : vector<2x32xf32>
    %295 = arith.divf %293, %294 : vector<2x32xf32>
    %296 = arith.index_cast %c7_i32 : i32 to index
    %c0_114 = arith.constant 0 : index
    %c0_115 = arith.constant 0 : index
    %297 = vector.load %arg2[%296, %c0_114, %c0_115] : memref<8x2x32xf32, #tpu.memory_space<vmem>>, vector<1x2x32xf32>
    %298 = vector.shape_cast %297 : vector<1x2x32xf32> to vector<2x32xf32>
    %299 = arith.addf %298, %283 : vector<2x32xf32>
    %300 = arith.negf %299 : vector<2x32xf32>
    %301 = math.exp %300 : vector<2x32xf32>
    %cst_116 = arith.constant 1.000000e+00 : f32
    %302 = vector.broadcast %cst_116 : f32 to vector<2x32xf32>
    %303 = arith.addf %302, %301 : vector<2x32xf32>
    %304 = arith.divf %302, %303 : vector<2x32xf32>
    %305 = arith.index_cast %c7_i32 : i32 to index
    %c0_117 = arith.constant 0 : index
    %c0_118 = arith.constant 0 : index
    %306 = vector.load %arg3[%305, %c0_117, %c0_118] : memref<8x2x32xf32, #tpu.memory_space<vmem>>, vector<1x2x32xf32>
    %307 = vector.shape_cast %306 : vector<1x2x32xf32> to vector<2x32xf32>
    %308 = arith.mulf %295, %286 : vector<2x32xf32>
    %309 = arith.addf %307, %308 : vector<2x32xf32>
    %310 = math.tanh %309 : vector<2x32xf32>
    %cst_119 = arith.constant 1.000000e+00 : f32
    %311 = vector.broadcast %cst_119 : f32 to vector<2x32xf32>
    %312 = arith.subf %311, %304 : vector<2x32xf32>
    %313 = arith.mulf %312, %310 : vector<2x32xf32>
    %314 = arith.mulf %304, %276 : vector<2x32xf32>
    %315 = arith.addf %313, %314 : vector<2x32xf32>
    %316 = arith.index_cast %c7_i32 : i32 to index
    %c0_120 = arith.constant 0 : index
    %c0_121 = arith.constant 0 : index
    %317 = vector.load %arg8[%316, %c0_120, %c0_121] : memref<8x2x32xf32, #tpu.memory_space<vmem>>, vector<1x2x32xf32>
    %318 = vector.shape_cast %317 : vector<1x2x32xf32> to vector<2x32xf32>
    %319 = vector.shape_cast %315 : vector<2x32xf32> to vector<1x2x32xf32>
    tpu.vector_store %arg8[%316, %c0_120, %c0_121], %319 {strides = array<i32>} : memref<8x2x32xf32, #tpu.memory_space<vmem>>, vector<1x2x32xf32>,
    %c8_i32 = arith.constant 8 : i32
    %c0_122 = arith.constant 0 : index
    %c0_123 = arith.constant 0 : index
    %320 = vector.load %arg9[%c0_122, %c0_123] : memref<2x32xf32, #tpu.memory_space<vmem>>, vector<2x32xf32>
    tpu.vector_store %arg9[%c0_122, %c0_123], %315 {strides = array<i32>} : memref<2x32xf32, #tpu.memory_space<vmem>>, vector<2x32xf32>,
    return
  }
  func.func @transform_0(%arg0: i32) -> (i32, i32, i32) {
    %c0_i32 = arith.constant 0 : i32
    %c0_i32_0 = arith.constant 0 : i32
    %c0_i32_1 = arith.constant 0 : i32
    return %arg0, %c0_i32, %c0_i32_0 : i32, i32, i32
  }
  func.func @transform_1(%arg0: i32) -> (i32, i32, i32) {
    %c0_i32 = arith.constant 0 : i32
    %c0_i32_0 = arith.constant 0 : i32
    %c0_i32_1 = arith.constant 0 : i32
    return %arg0, %c0_i32, %c0_i32_0 : i32, i32, i32
  }
  func.func @transform_2(%arg0: i32) -> (i32, i32, i32) {
    %c0_i32 = arith.constant 0 : i32
    %c0_i32_0 = arith.constant 0 : i32
    %c0_i32_1 = arith.constant 0 : i32
    return %arg0, %c0_i32, %c0_i32_0 : i32, i32, i32
  }
  func.func @transform_3(%arg0: i32) -> (i32, i32) {
    %c0_i32 = arith.constant 0 : i32
    %c0_i32_0 = arith.constant 0 : i32
    %c0_i32_1 = arith.constant 0 : i32
    return %c0_i32, %c0_i32_0 : i32, i32
  }
  func.func @transform_4(%arg0: i32) -> (i32, i32) {
    %c0_i32 = arith.constant 0 : i32
    %c0_i32_0 = arith.constant 0 : i32
    %c0_i32_1 = arith.constant 0 : i32
    return %c0_i32, %c0_i32_0 : i32, i32
  }
  func.func @transform_5(%arg0: i32) -> (i32, i32) {
    %c0_i32 = arith.constant 0 : i32
    %c0_i32_0 = arith.constant 0 : i32
    %c0_i32_1 = arith.constant 0 : i32
    return %c0_i32, %c0_i32_0 : i32, i32
  }
  func.func @transform_6(%arg0: i32) -> (i32, i32) {
    %c0_i32 = arith.constant 0 : i32
    %c0_i32_0 = arith.constant 0 : i32
    %c0_i32_1 = arith.constant 0 : i32
    return %c0_i32, %c0_i32_0 : i32, i32
  }
  func.func @transform_7(%arg0: i32) -> (i32, i32, i32) {
    %c0_i32 = arith.constant 0 : i32
    %c0_i32_0 = arith.constant 0 : i32
    %c0_i32_1 = arith.constant 0 : i32
    return %arg0, %c0_i32, %c0_i32_0 : i32, i32, i32
  }
}

</mosaic_0001>

<bundles_post_ra>
// kernel: tpu_custom_call.1
= control target key start
LH: loop header
LB: loop body
LE: loop exit
PB: predicated region body
PF: predicated region fallthrough
CT: control target
= control target key end

     0   :  { %s3241_s0 = inlined_call_operand.hbm [shape: f32[16,2,32], index: 0, kind: input, shape index: {}]   ;;  %s3242_s1 = inlined_call_operand.hbm [shape: f32[16,2,32], index: 1, kind: input, shape index: {}]   ;;  %s3243_s2 = inlined_call_operand.hbm [shape: f32[16,2,32], index: 2, kind: input, shape index: {}]   ;;  %s3244_s3 = inlined_call_operand.hbm [shape: bf16[32,32], index: 3, kind: input, shape index: {}]   ;;  %s3245_s4 = inlined_call_operand.hbm [shape: bf16[32,32], index: 4, kind: input, shape index: {}]   ;;  %s3246_s5 = inlined_call_operand.vmem [shape: bf16[32,32], index: 5, kind: input, shape index: {}]   ;;  %s3247_s6 = inlined_call_operand.vmem [shape: f32[1,32], index: 6, kind: input, shape index: {}]   ;;  %s3248_s7 = inlined_call_operand.hbm [shape: f32[16,2,32], index: 7, kind: output, shape index: {}]  }
   0x1   :  { %3268 = sst [smem:[#allocation22_spill]] %s3242_s1 }
   0x2   :  { %3269 = sst [smem:[#allocation23_spill]] %s3244_s3 }
   0x3   :  { %12 = vsyncpa [#allocation4], 0 }
   0x4   :  { %14 = vsyncpa [#allocation4 + $0x1], 0 }
   0x5   :  { %15 = vsyncpa [#allocation7], 0 }
   0x6   :  { %17 = vsyncpa [#allocation7 + $0x1], 0 }
   0x7   :  { %18 = vsyncpa [#allocation10], 0 }
   0x8   :  { %19 = vsyncpa [#allocation5], 0 }
   0x9   :  { %21 = vsyncpa [#allocation5 + $0x1], 0  ;;  %s2661_s24 = smov 0   ;;  %s2663_s25 = smov 0  }
   0xa   :  { %s2665_s26 = smov 0   ;;  %s2667_s27 = smov 0  }
   0xb LB: > { %3270 = sst [smem:[#allocation17_spill]] %s2592_s24  ;;  %s2682_s28 = sadd.s32 4294967295, %s2604_s27   ;;  %s2604_s27 = sphi %s2667_s27, %s3306_s27   ;;  %s2600_s26 = sphi %s2665_s26, %s3310_s26   ;;  %s2596_s25 = sphi %s2663_s25, %s3309_s25   ;;  %s2592_s24 = sphi %s2661_s24, %s3308_s24  }
   0xc   : > { %3271 = sst [smem:[#allocation18_spill]] %s2604_s27  ;;  %s1842_s29 = sadd.s32 4294967294, %s2604_s27  }
   0xd   : > { %s2686_s30 = sadd.s32 1, %s2604_s27   ;;  %s34_s8 = sadd.s32 1, %s2600_s26 }
   0xe   : > { %3272 = sst [smem:[#allocation19_spill]] %s2686_s30  ;;  %s31_s9 = ssub.s32 %s2604_s27, %s2686_s30 }
   0xf   : > { %p41_p0 = scmp.ne.s32.totalorder %s2600_s26, %s2596_s25  ;;  %p32_p1 = scmp.eq.s32.totalorder %s31_s9, 0 }
  0x10   : > { %p42_p2 = scmp.eq.s32.totalorder %s2604_s27, 0  ;;  %p47_p3 = scmp.ne.s32.totalorder %s2596_s25, %s2592_s24 }
  0x11   : > { %p3250_p4 = scmp.eq.s32.totalorder %s2682_s28, 0  ;;  %p207_p7 = scmp.eq.s32.totalorder %s2682_s28, 1 }
  0x12   : > { %s2698_s10 = scalar_select %p32_p1, %s2600_s26, %s34_s8  }
  0x13   : > { %p2700_p5 = por %p42_p2, %p41_p0  ;;  %p2706_p6 = por %p3250_p4, %p47_p3 }
  0x14   : > { %3273 = sst [smem:[#allocation20_spill]] %s2698_s10  ;;  %p213_p8 = scmp.eq.s32.totalorder %s1842_s29, 1 }
  0x15   : > { %s3274_s11 = scalar_select %p2700_p5, 1, 0 }
  0x16   : > { %s3275_s12 = scalar_select %p2706_p6, 1, 0 }
  0x17   : > { %p1843_p9 = scmp.ge.s32.totalorder %s2604_s27, 1  ;;  %p220_p10 = scmp.lt.s32.totalorder %s2604_s27, 3 }
  0x18   : > { %p2713_p11 = por %p207_p7, %p41_p0  ;;  %p2717_p12 = por %p213_p8, %p47_p3 }
  0x19   : > { %p2721_p13 = pnand %p1843_p9, %p220_p10  ;;  %s2606_s16 = smov [#allocation9]  }
  0x1a   : > { %s3276_s13 = scalar_select %p2713_p11, 1, 0 }
  0x1b   : > { %s3277_s14 = scalar_select %p2717_p12, 1, 0 }
  0x1c   : > { %s3279_s15 = scalar_select %p2721_p13, 1, 0 }
  0x1d   : > { %3278 = sst [smem:[#allocation21_spill]] %s3277_s14  ;;  %p2228_p2 = pneg %p2721_p13 }
  0x1e   : > { %s232_s17 = sshll.u32 %s2606_s16, 4  ;;  %s3249_s19 = sand.u32 1, %s2600_s26   ;;  %s233_s17 = int_to_ptr.vmem [resolvable:$true] %s232_s17 }
  0x1f   : > { %p2730_p0 = pnand %p2228_p2, %p3250_p4  ;;  %s2739_s20 = sshll.u32 %s3249_s19, 4 }
  0x20   : > { %s3281_s3 = sld [smem:[#allocation23_spill]] }
  0x21   : > { %s3280_s18 = scalar_select %p2730_p0, 1, 0 }
  0x22   : > { %p3258_p9 = pneg %p2730_p0 }
  0x26   : > { %s2384_s23 = scalar_lea.hbm %s3281_s3, 256 }
  0x27   : > { %p2385_p8 = scmp.ne.s32.totalorder %s3281_s3, %s2384_s23  ;;  %p2391_p3 = scmp.lt.u32.totalorder %s2384_s23, %s3281_s3 }
  0x29   : > { %p2387_p10 = pnand %p3258_p9, %p2385_p8 }
  0x2b   : > { %p2388_p2 = pneg %p2387_p10 }
  0x2d   : > { %p2393_p1 = pnand %p2391_p3, %p2388_p2 }
  0x2f   : > { %2396 = shalt.err (!%p2393_p1)
}
  0x30   : > { %s2397_s19 = scalar_lea.vmem %s233_s17, 256  ;;  %p2405_p11 = scmp.lt.s32.totalorder %s233_s17, %s233_s17 }
  0x31   : > { %p2398_p4 = scmp.ne.s32.totalorder %s233_s17, %s2397_s19  ;;  %p2406_p6 = scmp.lt.s32.totalorder %s2397_s19, %s2397_s19 }
  0x33   : > { %p2400_p7 = pnand %p2398_p4, %p3258_p9  ;;  %p2407_p13 = por %p2406_p6, %p2405_p11 }
  0x35   : > { %p2401_p12 = pneg %p2400_p7 }
  0x37   : > { %p2408_p5 = pnand %p2407_p13, %p2401_p12 }
  0x39   : > { %2411 = shalt.err (!%p2408_p5)
}
  0x3a   : > { %s3256_s21 = smov 64   ;;  %s3257_s22 = smov 4  }
  0x3b   : > { %2231 = dma.hbm_to_vmem [thread:$0]  (!%p2730_p0), %s3281_s3, 256, %s233_s17, [#allocation10], %s3256_s21, %s3256_s21, %s3257_s22  }
  0x3c   : > { %s2767_s19 = sshll.u32 %s2604_s27, 8  ;;  %p3282_p4 = scmp.ne.s32.totalorder %s3274_s11, 0 }
  0x3d   : > { %p3283_p5 = scmp.lt.s32.totalorder %s2604_s27, 2  ;;  %s286_s9 = sand.u32 1, %s2604_s27  }
  0x3e   : > { %s3285_s1 = sld [smem:[#allocation22_spill]]  ;;  %s290_s17 = scalar_lea.vmem [#allocation6], %s2739_s20 }
  0x3f   : > { %p2773_p6 = pnand %p3283_p5, %p3282_p4  ;;  %s297_s23 = sshll.u32 %s290_s17, 4  ;;  %s2785_s23 = int_to_ptr.vmem [resolvable:$true] %s297_s23 }
  0x40   : > { %s2787_s11 = scalar_lea.sflag [#allocation7], %s286_s9 }
  0x41   : > { %s3284_s8 = scalar_select %p2773_p6, 1, 0 }
  0x42   : > { %p2793_p12 = pneg %p2773_p6 }
  0x44   : > { %s2782_s30 = scalar_lea.hbm %s3285_s1, %s2767_s19  ;;  %s2417_s22 = scalar_lea.hbm %s3285_s1, 512 }
  0x45   : > { %s2412_s29 = scalar_lea.hbm %s2782_s30, 256  ;;  %p2418_p3 = scmp.lt.u32.totalorder %s2782_s30, %s3285_s1 }
  0x46   : > { %p2413_p11 = scmp.ne.s32.totalorder %s2782_s30, %s2412_s29  ;;  %p2419_p7 = scmp.lt.u32.totalorder %s2417_s22, %s2412_s29 }
  0x47   : > { %s3286_s21 = scalar_select %p2793_p12, 1, 0 }
  0x48   : > { %p2415_p13 = pnand %p2793_p12, %p2413_p11  ;;  %p2420_p8 = por %p2419_p7, %p2418_p3 }
  0x49   : > { %p2421_p10 = scmp.lt.u32.totalorder %s2412_s29, %s2782_s30 }
  0x4a   : > { %p2416_p1 = pneg %p2415_p13 }
  0x4b   : > { %p2422_p2 = por %p2421_p10, %p2420_p8 }
  0x4d   : > { %p2423_p4 = pnand %p2422_p2, %p2416_p1 }
  0x4f   : > { %2426 = shalt.err (!%p2423_p4)
}
  0x50   : > { %s2427_s9 = scalar_lea.vmem %s2785_s23, 256  ;;  %s2609_s10 = smov [#allocation6]  }
  0x51   : > { %p2428_p5 = scmp.ne.s32.totalorder %s2785_s23, %s2427_s9  ;;  %s2432_s16 = sshll.u32 %s2609_s10, 4  ;;  %s2433_s16 = int_to_ptr.vmem [resolvable:$false] %s2432_s16 }
  0x52   : > { %s2434_s3 = scalar_lea.vmem %s2433_s16, 512  ;;  %p2435_p9 = scmp.lt.s32.totalorder %s2785_s23, %s2433_s16 }
  0x53   : > { %p2430_p11 = pnand %p2428_p5, %p2793_p12  ;;  %p2436_p0 = scmp.lt.s32.totalorder %s2434_s3, %s2427_s9 }
  0x55   : > { %p2431_p13 = pneg %p2430_p11  ;;  %p2437_p3 = por %p2436_p0, %p2435_p9 }
  0x57   : > { %p2438_p7 = pnand %p2437_p3, %p2431_p13 }
  0x59   : > { %2441 = shalt.err (!%p2438_p7)
}
  0x5a   : > { %s2610_s22 = smov 32   ;;  %s2611_s29 = smov 2  }
  0x5b   : > { %2241 = dma.hbm_to_vmem [thread:$0]  (!%p2773_p6), %s2782_s30, 256, %s2785_s23, %s2787_s11, %s2610_s22, %s2610_s22, %s2611_s29  }
  0x5c   : > { %s2612_s17 = smov [#allocation11]   ;;  %s2442_s3 = scalar_lea.hbm %s3245_s4, 256 }
  0x5d   : > { %s245_s10 = sshll.u32 %s2612_s17, 4  ;;  %p2443_p0 = scmp.ne.s32.totalorder %s3245_s4, %s2442_s3  ;;  %s246_s10 = int_to_ptr.vmem [resolvable:$true] %s245_s10 }
  0x5e   : > { %p3287_p9 = scmp.ne.s32.totalorder %s3280_s18, 0  ;;  %p2449_p2 = scmp.lt.u32.totalorder %s2442_s3, %s3245_s4 }
  0x60   : > { %p3288_p1 = pneg %p3287_p9 }
  0x62   : > { %p2445_p8 = pnand %p2443_p0, %p3288_p1 }
  0x64   : > { %p2446_p10 = pneg %p2445_p8 }
  0x66   : > { %p2451_p4 = pnand %p2449_p2, %p2446_p10 }
  0x68   : > { %2454 = shalt.err (!%p2451_p4)
}
  0x69   : > { %s2455_s30 = scalar_lea.vmem %s246_s10, 256  ;;  %p3289_p11 = pmov %p3288_p1 }
  0x6a   : > { %p2456_p5 = scmp.ne.s32.totalorder %s246_s10, %s2455_s30  ;;  %p2463_p7 = scmp.lt.s32.totalorder %s246_s10, %s246_s10 }
  0x6b   : > { %p2464_p6 = scmp.lt.s32.totalorder %s2455_s30, %s2455_s30 }
  0x6c   : > { %p2458_p13 = pnand %p2456_p5, %p3289_p11 }
  0x6d   : > { %p2465_p12 = por %p2464_p6, %p2463_p7 }
  0x6e   : > { %p2459_p3 = pneg %p2458_p13 }
  0x70   : > { %p2466_p0 = pnand %p2465_p12, %p2459_p3 }
  0x72   : > { %2469 = shalt.err (!%p2466_p0)
}
  0x73   : > { %s3290_s1 = smov 4   ;;  %s3291_s27 = smov 64  }
  0x74   : > { %2234 = dma.hbm_to_vmem [thread:$0]  (!%p3287_p9), %s3245_s4, 256, %s246_s10, [#allocation10], %s3291_s27, %s3291_s27, %s3290_s1  }
  0x75   : > { %s2847_s16 = scalar_lea.hbm %s3241_s0, %s2767_s19  ;;  %s269_s18 = scalar_lea.vmem [#allocation3], %s2739_s20 }
  0x76   : > { %s276_s9 = sshll.u32 %s269_s18, 4  ;;  %s3292_s3 = sand.u32 1, %s2600_s26   ;;  %s2850_s9 = int_to_ptr.vmem [resolvable:$true] %s276_s9 }
  0x77   : > { %s2854_s30 = scalar_lea.sflag [#allocation4], %s3292_s3  ;;  %s2470_s24 = scalar_lea.hbm %s2847_s16, 256 }
  0x78   : > { %p2471_p6 = scmp.ne.s32.totalorder %s2847_s16, %s2470_s24  ;;  %p3293_p12 = scmp.ne.s32.totalorder %s3286_s21, 0 }
  0x79   : > { %s2475_s27 = scalar_lea.hbm %s3241_s0, 512  ;;  %p2476_p8 = scmp.lt.u32.totalorder %s2847_s16, %s3241_s0 }
  0x7a   : > { %p2473_p9 = pnand %p2471_p6, %p3293_p12  ;;  %p2477_p10 = scmp.lt.u32.totalorder %s2475_s27, %s2470_s24 }
  0x7b   : > { %p2479_p4 = scmp.lt.u32.totalorder %s2470_s24, %s2847_s16 }
  0x7c   : > { %p2474_p1 = pneg %p2473_p9  ;;  %p2478_p2 = por %p2477_p10, %p2476_p8 }
  0x7e   : > { %p2480_p5 = por %p2479_p4, %p2478_p2 }
  0x80   : > { %p2481_p11 = pnand %p2480_p5, %p2474_p1 }
  0x82   : > { %2484 = shalt.err (!%p2481_p11)
}
  0x83   : > { %s2485_s17 = scalar_lea.vmem %s2850_s9, 256  ;;  %s2613_s18 = smov [#allocation3]  }
  0x84   : > { %p2486_p13 = scmp.ne.s32.totalorder %s2850_s9, %s2485_s17  ;;  %s2490_s3 = sshll.u32 %s2613_s18, 4  ;;  %s2491_s3 = int_to_ptr.vmem [resolvable:$false] %s2490_s3 }
  0x85   : > { %s2492_s10 = scalar_lea.vmem %s2491_s3, 512  ;;  %p2493_p0 = scmp.lt.s32.totalorder %s2850_s9, %s2491_s3 }
  0x86   : > { %p2488_p3 = pnand %p2486_p13, %p3293_p12  ;;  %p2494_p6 = scmp.lt.s32.totalorder %s2492_s10, %s2485_s17 }
  0x88   : > { %p2489_p7 = pneg %p2488_p3  ;;  %p2495_p9 = por %p2494_p6, %p2493_p0 }
  0x8a   : > { %p2496_p8 = pnand %p2495_p9, %p2489_p7 }
  0x8c   : > { %2499 = shalt.err (!%p2496_p8)
}
  0x8d   : > { %p3294_p1 = scmp.ne.s32.totalorder %s3284_s8, 0  ;;  %s2885_s27 = scalar_lea.hbm %s3243_s2, %s2767_s19 }
  0x8e   : > { %s311_s14 = scalar_lea.vmem [#allocation8], %s2739_s20  ;;  %s2500_s17 = scalar_lea.hbm %s2885_s27, 256 }
  0x8f   : > { %2238 = dma.hbm_to_vmem [thread:$0]  (!%p3294_p1), %s2847_s16, 256, %s2850_s9, %s2854_s30, %s2610_s22, %s2610_s22, %s2611_s29  }
  0x90   : > { %s318_s23 = sshll.u32 %s311_s14, 4  ;;  %p2501_p10 = scmp.ne.s32.totalorder %s2885_s27, %s2500_s17  ;;  %s2888_s23 = int_to_ptr.vmem [resolvable:$true] %s318_s23 }
  0x91   : > { %s2505_s9 = scalar_lea.hbm %s3243_s2, 512  ;;  %p2506_p5 = scmp.lt.u32.totalorder %s2885_s27, %s3243_s2 }
  0x92   : > { %p2503_p2 = pnand %p2501_p10, %p3293_p12  ;;  %p2507_p11 = scmp.lt.u32.totalorder %s2505_s9, %s2500_s17 }
  0x93   : > { %p2509_p3 = scmp.lt.u32.totalorder %s2500_s17, %s2885_s27 }
  0x94   : > { %p2504_p4 = pneg %p2503_p2  ;;  %p2508_p13 = por %p2507_p11, %p2506_p5 }
  0x96   : > { %p2510_p7 = por %p2509_p3, %p2508_p13 }
  0x98   : > { %p2511_p0 = pnand %p2510_p7, %p2504_p4 }
  0x9a   : > { %2514 = shalt.err (!%p2511_p0)
}
  0x9b   : > { %s2515_s20 = scalar_lea.vmem %s2888_s23, 256  ;;  %s2614_s3 = smov [#allocation8]  }
  0x9c   : > { %p2516_p6 = scmp.ne.s32.totalorder %s2888_s23, %s2515_s20  ;;  %s2520_s10 = sshll.u32 %s2614_s3, 4  ;;  %s2521_s10 = int_to_ptr.vmem [resolvable:$false] %s2520_s10 }
  0x9d   : > { %s2522_s24 = scalar_lea.vmem %s2521_s10, 512  ;;  %p2523_p10 = scmp.lt.s32.totalorder %s2888_s23, %s2521_s10 }
  0x9e   : > { %p2518_p9 = pnand %p2516_p6, %p3293_p12  ;;  %p2524_p2 = scmp.lt.s32.totalorder %s2522_s24, %s2515_s20 }
  0xa0   : > { %p2519_p8 = pneg %p2518_p9  ;;  %p2525_p5 = por %p2524_p2, %p2523_p10 }
  0xa2   : > { %p2526_p11 = pnand %p2525_p5, %p2519_p8 }
  0xa4   : > { %2529 = shalt.err (!%p2526_p11)
}
  0xa5   : > { %2244 = dma.hbm_to_vmem [thread:$0]  (!%p3294_p1), %s2885_s27, 256, %s2888_s23, %s2787_s11, %s2610_s22, %s2610_s22, %s2611_s29  }
  0xa6   : > { %p3295_p12 = scmp.ne.s32.totalorder %s3279_s15, 0 }
  0xa7   : > { %s2918_s21 = sand.u32 (!%p3295_p12), 1, %s2596_s25   ;;  %p3296_p4 = scmp.ne.s32.totalorder (!%p3295_p12), %s3275_s12, 0 }
  0xa8   : > { %330 = sbr.rel (%p3295_p12) target bundleno = 2301 (0x8fd), region = 48  ;;  %s1857_s1 = sshll.u32 (!%p3295_p12), %s2918_s21, 4 }
  0xa9   : > { %s333_s14 = scalar_lea.sflag (!%p3295_p12), [#allocation4], %s2918_s21  ;;  %s2922_s17 = scalar_lea.vmem (!%p3295_p12), [#allocation3], %s1857_s1 }
  0xaf   : > { %2575 = dma.done.wait (%p3296_p4), %s333_s14, 256  }
  0xb0   : > { %2577 = vsyncadd (%p3296_p4), %s333_s14, 4294967040  ;;  %s341_s8 = sand.u32 1, %s2682_s28   ;;  %s2929_s11 = scalar_lea.vmem [#allocation6], %s1857_s1 }
  0xb1   : > { %s342_s15 = scalar_lea.sflag [#allocation7], %s341_s8 }
  0xb2   : > { %2579 = dma.done.wait (%p3296_p4), %s342_s15, 512  }
  0xb3   : > { %2581 = vsyncadd (%p3296_p4), %s342_s15, 4294966784  ;;  %s2935_s22 = scalar_lea.vmem [#allocation8], %s1857_s1  ;;  %p3297_p1 = scmp.eq.s32.totalorder %s2682_s28, 0 }
  0xb5   : > { %2583 = dma.done.wait (%p3297_p1), [#allocation10], 512   ;;  %p3298_p13 = pmov %p3297_p1 }
  0xb6   : > { %s2941_s29 = scalar_lea.vmem [#allocation12], %s1857_s1  ;;  %p3299_p3 = scmp.ne.s32.totalorder %s2682_s28, 0 }
  0xb7   : > { %2585 = vsyncadd (%p3298_p13), [#allocation10], 4294966784  ;;  %vm412_vm0 = vcmask (!%p3299_p3), 254976   ;;  %v2615_v0 = vmov (!%p3299_p3), 0.0  }
  0xb8   : > { %411 = sbr.rel (%p3299_p3) target bundleno = 191 (0xbf), region = 72  ;;  %413 = vst.msk [vmem:[#allocation2] sm:$0x3] (!%p3299_p3), %vm412_vm0, %v2615_v0 }
  0xbf PF: > { %v2945_v1 = vld [vmem:[#allocation9] sm:$0xff]   ;;  %v2616_v2 = vmov 0.0   ;;  %v2948_v3 = vld [vmem:[#allocation9 + $0x8] sm:$0xff]   ;;  %vm2617_vm1 = vmmov 0   ;;  %v2954_v4 = vld [vmem:[#allocation2] sm:$0x3] }
  0xc0   : > { %2020 = vmatprep.subr.bf16.mxu0 %v2616_v2  ;;  %2028 = vmatprep.subr.bf16.mxu1 %v2616_v2  ;;  %v2956_v5 = vld [vmem:[#allocation11] sm:$0xff]   ;;  %v2962_v6 = vld [vmem:[#allocation11 + $0x8] sm:$0xff]   ;;  %v428_v7 = vpack.c.bf16 %v2954_v4, %v2954_v4  ;;  %vm441_vm2 = vcmask 261120   ;;  %v2981_v9 = vld [vmem:[%s3246_s5 + $0x8] sm:$0xff]   ;;  %vm619_vm3 = vcmask 254976   ;;  %s1947_s30 = sshll.u32 %s2682_s28, 8 }
  0xc1   : > { %2021 = vmatpush3.bf16.msra.mxu0 %v2945_v1  ;;  %2024 = vmatprep.mubr.msk.bf16.mxu0 %vm2617_vm1, %v2616_v2  ;;  %v2971_v8 = vld [vmem:[%s3246_s5] sm:$0xff]   ;;  %s1707_s19 = sshll.u32 %s2941_s29, 4  ;;  %s3192_s10 = scalar_lea.hbm %s3248_s7, %s1947_s30  ;;  %s3194_s19 = int_to_ptr.vmem [resolvable:$true] %s1707_s19 }
  0xc2   : > { %2022 = vmatprep.subr.bf16.mxu0 %v2616_v2  ;;  %2032 = vmatprep.mubr.msk.bf16.mxu1 %vm2617_vm1, %v2616_v2  ;;  %v595_v10 = vld [vmem:[%s2922_s17] sm:$0x3]  ;;  %v3007_v31 = vld [vmem:[%s3247_s6] ss:$0 sm:$0xff]  ;;  %v1879_v45 = vld [vmem:[%s2922_s17 + $0x2] sm:$0x3] }
  0xc3   : > { %2029 = vmatpush3.bf16.msra.mxu1 %v2956_v5  ;;  %v603_v12 = vld [vmem:[%s2929_s11] sm:$0x3]  ;;  %v1881_v49 = vld [vmem:[%s2929_s11 + $0x2] sm:$0x3]  ;;  %s1694_s28 = scalar_lea.sflag [#allocation5], %s2918_s21  ;;  %s2530_s24 = scalar_lea.vmem %s3194_s19, 256 }
  0xc4   : > { %2030 = vmatprep.subr.bf16.mxu1 %v2616_v2  ;;  %v611_v35 = vld [vmem:[%s2935_s22] sm:$0x3]  ;;  %p2531_p7 = scmp.ne.s32.totalorder %s3194_s19, %s2530_s24  ;;  %p3300_p0 = scmp.ne.s32.totalorder %s3276_s13, 0 }
  0xc5   : > { %2023 = vmatpush3.bf16.msra.mxu0 %v2948_v3  ;;  %s2618_s1 = smov [#allocation12]  }
  0xc6   : > { %2036 = vmatprep.subr.bf16.mxu0 %v2616_v2  ;;  %p2532_p6 = pnand %p2531_p7, %p3300_p0  ;;  %s2534_s14 = sshll.u32 %s2618_s1, 4  ;;  %s2535_s14 = int_to_ptr.vmem [resolvable:$false] %s2534_s14 }
  0xc7   : > { %2031 = vmatpush3.bf16.msra.mxu1 %v2962_v6  ;;  %p2537_p8 = scmp.lt.s32.totalorder %s3194_s19, %s2535_s14 }
  0xc8   : > { %2025 = vmatmul.mubr.msk.bf16.vlgmr.msra.gmra.mrb[0].mxu0 %vm441_vm2, %v428_v7  ;;  %2044 = vmatprep.subr.bf16.mxu1 %v2616_v2  ;;  %p2533_p9 = pneg %p2532_p6 }
  0xc9   : > { %2037 = vmatpush3.bf16.msra.mxu0 %v2971_v8  ;;  %2040 = vmatprep.mubr.msk.bf16.mxu0 %vm2617_vm1, %v2616_v2 }
  0xca   : > { %2033 = vmatmul.mubr.msk.bf16.vlgmr.msra.gmra.mrb[0].mxu1 %vm441_vm2, %v428_v7  ;;  %2038 = vmatprep.subr.bf16.mxu0 %v2616_v2 }
  0xcb   : > { %2045 = vmatpush3.bf16.msra.mxu1 %v2945_v1  ;;  %2048 = vmatprep.mubr.msk.bf16.mxu1 %vm2617_vm1, %v2616_v2 }
  0xcc   : > { %2046 = vmatprep.subr.bf16.mxu1 %v2616_v2 }
  0xcd   : > { %2039 = vmatpush3.bf16.msra.mxu0 %v2981_v9 }
  0xce   : > { %2052 = vmatprep.subr.bf16.mxu0 %v2616_v2 }
  0xcf   : > { %2047 = vmatpush3.bf16.msra.mxu1 %v2948_v3 }
  0xd0   : > { %2041 = vmatmul.mubr.msk.bf16.vlgmr.msra.gmra.mrb[4].mxu0 %vm441_vm2, %v428_v7  ;;  %2060 = vmatprep.subr.bf16.mxu1 %v2616_v2 }
  0xd1   : > { %2053 = vmatpush3.bf16.msra.mxu0 %v2956_v5  ;;  %2056 = vmatprep.mubr.msk.bf16.mxu0 %vm2617_vm1, %v2616_v2 }
  0xd2   : > { %2054 = vmatprep.subr.bf16.mxu0 %v2616_v2 }
  0xd5   : > { %2055 = vmatpush3.bf16.msra.mxu0 %v2962_v6 }
  0xd6   : > { %2068 = vmatprep.subr.bf16.mxu0 %v2616_v2 }
 0x19b   : > { %v479_v11 = vpop.f32.mrb[0].mxu0 }
 0x19c   : > { %v596_v13 = vadd.f32 %v595_v10, %v479_v11  ;;  %v2026_v14 = vpop.f32.mrb[1].mxu0 }
 0x19d   : > { %v482_v15 = vpop.f32.mrb[2].mxu0  ;;  %v531_v16 = vpop.f32.mrb[0].mxu1 }
 0x19e   : > { %v1874_v17 = vmul.f32 -1.442695, %v596_v13  ;;  %v2027_v18 = vpop.f32.mrb[3].mxu0  ;;  %v604_v19 = vadd.f32 %v603_v12, %v531_v16  ;;  %v2034_v20 = vpop.f32.mrb[1].mxu1  ;;  %v1883_v12 = vld [vmem:[%s2935_s22 + $0x2] sm:$0x3] }
 0x19f   : > { %v534_v21 = vpop.f32.mrb[2].mxu1 }
 0x1a0   : > { %2304 = vpow2.f32 %v1874_v17  ;;  %v2035_v22 = vpop.f32.mrb[3].mxu1  ;;  %v1875_v23 = vmul.f32 -1.442695, %v604_v19 }
 0x1a1   : > { %v1888_v22 = vld [vmem:[%s2922_s17 + $0x4] sm:$0x3] }
 0x1a2   : > { %2306 = vpow2.f32 %v1875_v23 }
 0x1a3   : > { %v589_v24 = vpop.f32.mrb[4].mxu0 }
 0x1a4   : > { %v2042_v25 = vpop.f32.mrb[5].mxu0  ;;  %v590_v33 = vadd.f32 %v3007_v31, %v589_v24 }
 0x1a5   : > { %v592_v26 = vpop.f32.mrb[6].mxu0 }
 0x1a6   : > { %v2043_v27 = vpop.f32.mrb[7].mxu0  ;;  %v1890_v26 = vld [vmem:[%s2929_s11 + $0x4] sm:$0x3] }
 0x1aa   : > { %v2305_v28 = vpop.eup %2304 }
 0x1ab   : > { %v600_v29 = vadd.f32 1.0, %v2305_v28 }
 0x1ac   : > { %v2307_v30 = vpop.eup %2306 }
 0x1ad   : > { %2308 = vrcp.f32 %v600_v29  ;;  %v608_v32 = vadd.f32 1.0, %v2307_v30 }
 0x1af   : > { %2310 = vrcp.f32 %v608_v32 }
 0x1b7   : > { %v2309_v34 = vpop.eup %2308 }
 0x1b8   : > { %v612_v36 = vmul.f32 %v2309_v34, %v590_v33 }
 0x1b9   : > { %v2311_v38 = vpop.eup %2310 }
 0x1ba   : > { %v613_v37 = vadd.f32 %v612_v36, %v611_v35  ;;  %v615_v39 = vsub.f32 1.0, %v2311_v38  ;;  %v617_v41 = vmul.f32 %v2311_v38, %v2954_v4 }
 0x1bc   : > { %2312 = vtanh.f32 %v613_v37 }
 0x1c6   : > { %v2313_v40 = vpop.eup %2312 }
 0x1c7   : > { %v616_v42 = vmul.f32 %v2313_v40, %v615_v39 }
 0x1c9   : > { %v618_v43 = vadd.f32 %v617_v41, %v616_v42 }
 0x1cb   : > { %620 = vst.msk [vmem:[%s2941_s29] sm:$0x3] %vm619_vm3, %v618_v43  ;;  %v621_v44 = vpack.c.bf16 %v618_v43, %v618_v43 }
 0x1cd   : > { %2049 = vmatmul.mubr.msk.bf16.vlgmr.msra.gmra.mrb[4].mxu1 %vm441_vm2, %v621_v44  ;;  %2057 = vmatmul.mubr.msk.bf16.vlgmr.msra.gmra.mrb[8].mxu0 %vm441_vm2, %v621_v44 }
 0x1ce   : > { %2061 = vmatpush3.bf16.msra.mxu1 %v2971_v8  ;;  %2064 = vmatprep.mubr.msk.bf16.mxu1 %vm2617_vm1, %v2616_v2 }
 0x1cf   : > { %2062 = vmatprep.subr.bf16.mxu1 %v2616_v2  ;;  %2069 = vmatpush3.bf16.msra.mxu0 %v2945_v1 }
 0x1d0   : > { %2070 = vmatprep.subr.bf16.mxu0 %v2616_v2  ;;  %2072 = vmatprep.mubr.msk.bf16.mxu0 %vm2617_vm1, %v2616_v2 }
 0x1d2   : > { %2063 = vmatpush3.bf16.msra.mxu1 %v2981_v9 }
 0x1d3   : > { %2076 = vmatprep.subr.bf16.mxu1 %v2616_v2  ;;  %2071 = vmatpush3.bf16.msra.mxu0 %v2948_v3 }
 0x1d4   : > { %2084 = vmatprep.subr.bf16.mxu0 %v2616_v2 }
 0x1d5   : > { %2065 = vmatmul.mubr.msk.bf16.vlgmr.msra.gmra.mrb[8].mxu1 %vm441_vm2, %v621_v44 }
 0x1d6   : > { %2077 = vmatpush3.bf16.msra.mxu1 %v2956_v5  ;;  %2080 = vmatprep.mubr.msk.bf16.mxu1 %vm2617_vm1, %v2616_v2 }
 0x1d7   : > { %2078 = vmatprep.subr.bf16.mxu1 %v2616_v2 }
 0x1da   : > { %2079 = vmatpush3.bf16.msra.mxu1 %v2962_v6 }
 0x1db   : > { %2092 = vmatprep.subr.bf16.mxu1 %v2616_v2 }
 0x2a0   : > { %v659_v46 = vpop.f32.mrb[4].mxu1  ;;  %v699_v47 = vpop.f32.mrb[8].mxu0 }
 0x2a1   : > { %v747_v48 = vadd.f32 %v1879_v45, %v659_v46  ;;  %v2050_v50 = vpop.f32.mrb[5].mxu1  ;;  %v2058_v51 = vpop.f32.mrb[9].mxu0  ;;  %v756_v57 = vadd.f32 %v1881_v49, %v699_v47  ;;  %v1892_v47 = vld [vmem:[%s2935_s22 + $0x4] sm:$0x3] }
 0x2a2   : > { %v662_v52 = vpop.f32.mrb[6].mxu1  ;;  %v702_v53 = vpop.f32.mrb[10].mxu0 }
 0x2a3   : > { %v1880_v54 = vmul.f32 -1.442695, %v747_v48  ;;  %v2051_v55 = vpop.f32.mrb[7].mxu1  ;;  %v2059_v56 = vpop.f32.mrb[11].mxu0  ;;  %v1882_v58 = vmul.f32 -1.442695, %v756_v57 }
 0x2a4   : > { %v1897_v57 = vld [vmem:[%s2922_s17 + $0x6] sm:$0x3] }
 0x2a5   : > { %2314 = vpow2.f32 %v1880_v54 }
 0x2a6   : > { %2316 = vpow2.f32 %v1882_v58 }
 0x2a8   : > { %v739_v59 = vpop.f32.mrb[8].mxu1 }
 0x2a9   : > { %v2066_v60 = vpop.f32.mrb[9].mxu1  ;;  %v740_v10 = vadd.f32 %v3007_v31, %v739_v59 }
 0x2aa   : > { %v742_v61 = vpop.f32.mrb[10].mxu1 }
 0x2ab   : > { %v2067_v62 = vpop.f32.mrb[11].mxu1  ;;  %v1899_v61 = vld [vmem:[%s2929_s11 + $0x6] sm:$0x3] }
 0x2af   : > { %v2315_v63 = vpop.eup %2314 }
 0x2b0   : > { %v751_v0 = vadd.f32 1.0, %v2315_v63  ;;  %v2317_v4 = vpop.eup %2316 }
 0x2b1   : > { %v760_v7 = vadd.f32 1.0, %v2317_v4 }
 0x2b2   : > { %2318 = vrcp.f32 %v751_v0 }
 0x2b3   : > { %2320 = vrcp.f32 %v760_v7 }
 0x2bc   : > { %v2319_v11 = vpop.eup %2318 }
 0x2bd   : > { %v765_v13 = vmul.f32 %v2319_v11, %v740_v10  ;;  %v2321_v15 = vpop.eup %2320 }
 0x2be   : > { %v768_v16 = vsub.f32 1.0, %v2321_v15  ;;  %v770_v18 = vmul.f32 %v2321_v15, %v618_v43 }
 0x2bf   : > { %v766_v14 = vadd.f32 %v1883_v12, %v765_v13 }
 0x2c1   : > { %2322 = vtanh.f32 %v766_v14 }
 0x2cb   : > { %v2323_v17 = vpop.eup %2322 }
 0x2cc   : > { %v769_v19 = vmul.f32 %v2323_v17, %v768_v16 }
 0x2ce   : > { %v771_v20 = vadd.f32 %v770_v18, %v769_v19 }
 0x2d0   : > { %1884 = vst.msk [vmem:[%s2941_s29 + $0x2] sm:$0x3] %vm619_vm3, %v771_v20  ;;  %v774_v21 = vpack.c.bf16 %v771_v20, %v771_v20 }
 0x2d2   : > { %2073 = vmatmul.mubr.msk.bf16.vlgmr.msra.gmra.mrb[12].mxu0 %vm441_vm2, %v774_v21  ;;  %2081 = vmatmul.mubr.msk.bf16.vlgmr.msra.gmra.mrb[12].mxu1 %vm441_vm2, %v774_v21 }
 0x2d3   : > { %2085 = vmatpush3.bf16.msra.mxu0 %v2971_v8  ;;  %2088 = vmatprep.mubr.msk.bf16.mxu0 %vm2617_vm1, %v2616_v2 }
 0x2d4   : > { %2086 = vmatprep.subr.bf16.mxu0 %v2616_v2  ;;  %2093 = vmatpush3.bf16.msra.mxu1 %v2945_v1 }
 0x2d5   : > { %2094 = vmatprep.subr.bf16.mxu1 %v2616_v2  ;;  %2096 = vmatprep.mubr.msk.bf16.mxu1 %vm2617_vm1, %v2616_v2 }
 0x2d7   : > { %2087 = vmatpush3.bf16.msra.mxu0 %v2981_v9 }
 0x2d8   : > { %2100 = vmatprep.subr.bf16.mxu0 %v2616_v2  ;;  %2095 = vmatpush3.bf16.msra.mxu1 %v2948_v3 }
 0x2d9   : > { %2108 = vmatprep.subr.bf16.mxu1 %v2616_v2 }
 0x2da   : > { %2089 = vmatmul.mubr.msk.bf16.vlgmr.msra.gmra.mrb[16].mxu0 %vm441_vm2, %v774_v21 }
 0x2db   : > { %2101 = vmatpush3.bf16.msra.mxu0 %v2956_v5  ;;  %2104 = vmatprep.mubr.msk.bf16.mxu0 %vm2617_vm1, %v2616_v2 }
 0x2dc   : > { %2102 = vmatprep.subr.bf16.mxu0 %v2616_v2 }
 0x2df   : > { %2103 = vmatpush3.bf16.msra.mxu0 %v2962_v6 }
 0x2e0   : > { %2116 = vmatprep.subr.bf16.mxu0 %v2616_v2 }
 0x3a5   : > { %v812_v23 = vpop.f32.mrb[12].mxu0  ;;  %v852_v24 = vpop.f32.mrb[12].mxu1 }
 0x3a6   : > { %v900_v25 = vadd.f32 %v1888_v22, %v812_v23  ;;  %v2074_v27 = vpop.f32.mrb[13].mxu0  ;;  %v2082_v28 = vpop.f32.mrb[13].mxu1  ;;  %v909_v35 = vadd.f32 %v1890_v26, %v852_v24  ;;  %v1901_v24 = vld [vmem:[%s2935_s22 + $0x6] sm:$0x3] }
 0x3a7   : > { %v815_v29 = vpop.f32.mrb[14].mxu0  ;;  %v855_v30 = vpop.f32.mrb[14].mxu1 }
 0x3a8   : > { %v1889_v32 = vmul.f32 -1.442695, %v900_v25  ;;  %v2075_v33 = vpop.f32.mrb[15].mxu0  ;;  %v2083_v34 = vpop.f32.mrb[15].mxu1  ;;  %v1891_v36 = vmul.f32 -1.442695, %v909_v35 }
 0x3a9   : > { %v1906_v35 = vld [vmem:[%s2922_s17 + $0x8] sm:$0x3] }
 0x3aa   : > { %2324 = vpow2.f32 %v1889_v32 }
 0x3ab   : > { %2326 = vpow2.f32 %v1891_v36 }
 0x3ad   : > { %v892_v37 = vpop.f32.mrb[16].mxu0 }
 0x3ae   : > { %v2090_v38 = vpop.f32.mrb[17].mxu0  ;;  %v893_v45 = vadd.f32 %v3007_v31, %v892_v37 }
 0x3af   : > { %v895_v39 = vpop.f32.mrb[18].mxu0 }
 0x3b0   : > { %v2091_v40 = vpop.f32.mrb[19].mxu0  ;;  %v1908_v39 = vld [vmem:[%s2929_s11 + $0x8] sm:$0x3] }
 0x3b4   : > { %v2325_v41 = vpop.eup %2324 }
 0x3b5   : > { %v904_v42 = vadd.f32 1.0, %v2325_v41  ;;  %v2327_v43 = vpop.eup %2326 }
 0x3b6   : > { %v913_v44 = vadd.f32 1.0, %v2327_v43 }
 0x3b7   : > { %2328 = vrcp.f32 %v904_v42 }
 0x3b8   : > { %2330 = vrcp.f32 %v913_v44 }
 0x3c1   : > { %v2329_v46 = vpop.eup %2328 }
 0x3c2   : > { %v918_v48 = vmul.f32 %v2329_v46, %v893_v45  ;;  %v2331_v50 = vpop.eup %2330 }
 0x3c3   : > { %v921_v51 = vsub.f32 1.0, %v2331_v50  ;;  %v923_v53 = vmul.f32 %v2331_v50, %v771_v20 }
 0x3c4   : > { %v919_v49 = vadd.f32 %v1892_v47, %v918_v48 }
 0x3c6   : > { %2332 = vtanh.f32 %v919_v49 }
 0x3d0   : > { %v2333_v52 = vpop.eup %2332 }
 0x3d1   : > { %v922_v54 = vmul.f32 %v2333_v52, %v921_v51 }
 0x3d3   : > { %v924_v55 = vadd.f32 %v923_v53, %v922_v54 }
 0x3d5   : > { %1893 = vst.msk [vmem:[%s2941_s29 + $0x4] sm:$0x3] %vm619_vm3, %v924_v55  ;;  %v927_v56 = vpack.c.bf16 %v924_v55, %v924_v55 }
 0x3d7   : > { %2097 = vmatmul.mubr.msk.bf16.vlgmr.msra.gmra.mrb[16].mxu1 %vm441_vm2, %v927_v56  ;;  %2105 = vmatmul.mubr.msk.bf16.vlgmr.msra.gmra.mrb[20].mxu0 %vm441_vm2, %v927_v56 }
 0x3d8   : > { %2109 = vmatpush3.bf16.msra.mxu1 %v2971_v8  ;;  %2112 = vmatprep.mubr.msk.bf16.mxu1 %vm2617_vm1, %v2616_v2 }
 0x3d9   : > { %2110 = vmatprep.subr.bf16.mxu1 %v2616_v2  ;;  %2117 = vmatpush3.bf16.msra.mxu0 %v2945_v1 }
 0x3da   : > { %2118 = vmatprep.subr.bf16.mxu0 %v2616_v2  ;;  %2120 = vmatprep.mubr.msk.bf16.mxu0 %vm2617_vm1, %v2616_v2 }
 0x3dc   : > { %2111 = vmatpush3.bf16.msra.mxu1 %v2981_v9 }
 0x3dd   : > { %2124 = vmatprep.subr.bf16.mxu1 %v2616_v2  ;;  %2119 = vmatpush3.bf16.msra.mxu0 %v2948_v3 }
 0x3de   : > { %2132 = vmatprep.subr.bf16.mxu0 %v2616_v2 }
 0x3df   : > { %2113 = vmatmul.mubr.msk.bf16.vlgmr.msra.gmra.mrb[20].mxu1 %vm441_vm2, %v927_v56 }
 0x3e0   : > { %2125 = vmatpush3.bf16.msra.mxu1 %v2956_v5  ;;  %2128 = vmatprep.mubr.msk.bf16.mxu1 %vm2617_vm1, %v2616_v2 }
 0x3e1   : > { %2126 = vmatprep.subr.bf16.mxu1 %v2616_v2 }
 0x3e4   : > { %2127 = vmatpush3.bf16.msra.mxu1 %v2962_v6 }
 0x3e5   : > { %2140 = vmatprep.subr.bf16.mxu1 %v2616_v2 }
 0x4aa   : > { %v965_v58 = vpop.f32.mrb[16].mxu1  ;;  %v1005_v59 = vpop.f32.mrb[20].mxu0 }
 0x4ab   : > { %v1053_v60 = vadd.f32 %v1897_v57, %v965_v58  ;;  %v2098_v62 = vpop.f32.mrb[17].mxu1  ;;  %v2106_v63 = vpop.f32.mrb[21].mxu0  ;;  %v1062_v12 = vadd.f32 %v1899_v61, %v1005_v59  ;;  %v1910_v59 = vld [vmem:[%s2935_s22 + $0x8] sm:$0x3] }
 0x4ac   : > { %v968_v0 = vpop.f32.mrb[18].mxu1  ;;  %v1008_v4 = vpop.f32.mrb[22].mxu0 }
 0x4ad   : > { %v1898_v7 = vmul.f32 -1.442695, %v1053_v60  ;;  %v2099_v10 = vpop.f32.mrb[19].mxu1  ;;  %v2107_v11 = vpop.f32.mrb[23].mxu0  ;;  %v1900_v13 = vmul.f32 -1.442695, %v1062_v12 }
 0x4ae   : > { %v1915_v12 = vld [vmem:[%s2922_s17 + $0xa] sm:$0x3] }
 0x4af   : > { %2334 = vpow2.f32 %v1898_v7 }
 0x4b0   : > { %2336 = vpow2.f32 %v1900_v13 }
 0x4b2   : > { %v1045_v14 = vpop.f32.mrb[20].mxu1 }
 0x4b3   : > { %v2114_v15 = vpop.f32.mrb[21].mxu1  ;;  %v1046_v22 = vadd.f32 %v3007_v31, %v1045_v14 }
 0x4b4   : > { %v1048_v16 = vpop.f32.mrb[22].mxu1 }
 0x4b5   : > { %v2115_v17 = vpop.f32.mrb[23].mxu1  ;;  %v1917_v16 = vld [vmem:[%s2929_s11 + $0xa] sm:$0x3] }
 0x4b9   : > { %v2335_v18 = vpop.eup %2334 }
 0x4ba   : > { %v1057_v19 = vadd.f32 1.0, %v2335_v18  ;;  %v2337_v20 = vpop.eup %2336 }
 0x4bb   : > { %v1066_v21 = vadd.f32 1.0, %v2337_v20 }
 0x4bc   : > { %2338 = vrcp.f32 %v1057_v19 }
 0x4bd   : > { %2340 = vrcp.f32 %v1066_v21 }
 0x4c6   : > { %v2339_v23 = vpop.eup %2338 }
 0x4c7   : > { %v1071_v25 = vmul.f32 %v2339_v23, %v1046_v22  ;;  %v2341_v27 = vpop.eup %2340 }
 0x4c8   : > { %v1074_v28 = vsub.f32 1.0, %v2341_v27  ;;  %v1076_v30 = vmul.f32 %v2341_v27, %v924_v55 }
 0x4c9   : > { %v1072_v26 = vadd.f32 %v1901_v24, %v1071_v25 }
 0x4cb   : > { %2342 = vtanh.f32 %v1072_v26 }
 0x4d5   : > { %v2343_v29 = vpop.eup %2342 }
 0x4d6   : > { %v1075_v32 = vmul.f32 %v2343_v29, %v1074_v28 }
 0x4d8   : > { %v1077_v33 = vadd.f32 %v1076_v30, %v1075_v32 }
 0x4da   : > { %1902 = vst.msk [vmem:[%s2941_s29 + $0x6] sm:$0x3] %vm619_vm3, %v1077_v33  ;;  %v1080_v34 = vpack.c.bf16 %v1077_v33, %v1077_v33 }
 0x4dc   : > { %2121 = vmatmul.mubr.msk.bf16.vlgmr.msra.gmra.mrb[24].mxu0 %vm441_vm2, %v1080_v34  ;;  %2129 = vmatmul.mubr.msk.bf16.vlgmr.msra.gmra.mrb[24].mxu1 %vm441_vm2, %v1080_v34 }
 0x4dd   : > { %2133 = vmatpush3.bf16.msra.mxu0 %v2971_v8  ;;  %2136 = vmatprep.mubr.msk.bf16.mxu0 %vm2617_vm1, %v2616_v2 }
 0x4de   : > { %2134 = vmatprep.subr.bf16.mxu0 %v2616_v2  ;;  %2141 = vmatpush3.bf16.msra.mxu1 %v2945_v1 }
 0x4df   : > { %2142 = vmatprep.subr.bf16.mxu1 %v2616_v2  ;;  %2144 = vmatprep.mubr.msk.bf16.mxu1 %vm2617_vm1, %v2616_v2 }
 0x4e1   : > { %2135 = vmatpush3.bf16.msra.mxu0 %v2981_v9 }
 0x4e2   : > { %2148 = vmatprep.subr.bf16.mxu0 %v2616_v2  ;;  %2143 = vmatpush3.bf16.msra.mxu1 %v2948_v3 }
 0x4e3   : > { %2156 = vmatprep.subr.bf16.mxu1 %v2616_v2 }
 0x4e4   : > { %2137 = vmatmul.mubr.msk.bf16.vlgmr.msra.gmra.mrb[28].mxu0 %vm441_vm2, %v1080_v34 }
 0x4e5   : > { %2149 = vmatpush3.bf16.msra.mxu0 %v2956_v5  ;;  %2152 = vmatprep.mubr.msk.bf16.mxu0 %vm2617_vm1, %v2616_v2 }
 0x4e6   : > { %2150 = vmatprep.subr.bf16.mxu0 %v2616_v2 }
 0x4e9   : > { %2151 = vmatpush3.bf16.msra.mxu0 %v2962_v6 }
 0x4ea   : > { %2164 = vmatprep.subr.bf16.mxu0 %v2616_v2 }
 0x5af   : > { %v1118_v36 = vpop.f32.mrb[24].mxu0  ;;  %v1158_v37 = vpop.f32.mrb[24].mxu1 }
 0x5b0   : > { %v1206_v38 = vadd.f32 %v1906_v35, %v1118_v36  ;;  %v2122_v40 = vpop.f32.mrb[25].mxu0  ;;  %v2130_v41 = vpop.f32.mrb[25].mxu1  ;;  %v1215_v47 = vadd.f32 %v1908_v39, %v1158_v37  ;;  %v1919_v37 = vld [vmem:[%s2935_s22 + $0xa] sm:$0x3] }
 0x5b1   : > { %v1121_v42 = vpop.f32.mrb[26].mxu0  ;;  %v1161_v43 = vpop.f32.mrb[26].mxu1 }
 0x5b2   : > { %v1907_v44 = vmul.f32 -1.442695, %v1206_v38  ;;  %v2123_v45 = vpop.f32.mrb[27].mxu0  ;;  %v2131_v46 = vpop.f32.mrb[27].mxu1  ;;  %v1909_v48 = vmul.f32 -1.442695, %v1215_v47 }
 0x5b4   : > { %2344 = vpow2.f32 %v1907_v44 }
 0x5b5   : > { %2346 = vpow2.f32 %v1909_v48 }
 0x5b7   : > { %v1198_v49 = vpop.f32.mrb[28].mxu0 }
 0x5b8   : > { %v2138_v50 = vpop.f32.mrb[29].mxu0  ;;  %v1199_v57 = vadd.f32 %v3007_v31, %v1198_v49 }
 0x5b9   : > { %v1201_v51 = vpop.f32.mrb[30].mxu0  ;;  %v1926_v50 = vld [vmem:[%s2929_s11 + $0xc] sm:$0x3] }
 0x5ba   : > { %v2139_v52 = vpop.f32.mrb[31].mxu0 }
 0x5be   : > { %v2345_v53 = vpop.eup %2344 }
 0x5bf   : > { %v1210_v54 = vadd.f32 1.0, %v2345_v53  ;;  %v2347_v55 = vpop.eup %2346 }
 0x5c0   : > { %v1219_v56 = vadd.f32 1.0, %v2347_v55 }
 0x5c1   : > { %2348 = vrcp.f32 %v1210_v54 }
 0x5c2   : > { %2350 = vrcp.f32 %v1219_v56 }
 0x5cb   : > { %v2349_v58 = vpop.eup %2348 }
 0x5cc   : > { %v1224_v60 = vmul.f32 %v2349_v58, %v1199_v57  ;;  %v2351_v62 = vpop.eup %2350 }
 0x5cd   : > { %v1227_v63 = vsub.f32 1.0, %v2351_v62  ;;  %v1229_v4 = vmul.f32 %v2351_v62, %v1077_v33 }
 0x5ce   : > { %v1225_v61 = vadd.f32 %v1910_v59, %v1224_v60 }
 0x5d0   : > { %2352 = vtanh.f32 %v1225_v61 }
 0x5da   : > { %v2353_v0 = vpop.eup %2352 }
 0x5db   : > { %v1228_v7 = vmul.f32 %v2353_v0, %v1227_v63 }
 0x5dd   : > { %v1230_v10 = vadd.f32 %v1229_v4, %v1228_v7 }
 0x5df   : > { %1911 = vst.msk [vmem:[%s2941_s29 + $0x8] sm:$0x3] %vm619_vm3, %v1230_v10  ;;  %v1233_v11 = vpack.c.bf16 %v1230_v10, %v1230_v10 }
 0x5e1   : > { %2145 = vmatmul.mubr.msk.bf16.vlgmr.msra.gmra.mrb[28].mxu1 %vm441_vm2, %v1233_v11  ;;  %2153 = vmatmul.mubr.msk.bf16.vlgmr.msra.gmra.mrb[32].mxu0 %vm441_vm2, %v1233_v11 }
 0x5e2   : > { %2157 = vmatpush3.bf16.msra.mxu1 %v2971_v8  ;;  %2160 = vmatprep.mubr.msk.bf16.mxu1 %vm2617_vm1, %v2616_v2 }
 0x5e3   : > { %2158 = vmatprep.subr.bf16.mxu1 %v2616_v2  ;;  %2165 = vmatpush3.bf16.msra.mxu0 %v2945_v1 }
 0x5e4   : > { %2166 = vmatprep.subr.bf16.mxu0 %v2616_v2  ;;  %2168 = vmatprep.mubr.msk.bf16.mxu0 %vm2617_vm1, %v2616_v2 }
 0x5e6   : > { %2159 = vmatpush3.bf16.msra.mxu1 %v2981_v9 }
 0x5e7   : > { %2172 = vmatprep.subr.bf16.mxu1 %v2616_v2  ;;  %2167 = vmatpush3.bf16.msra.mxu0 %v2948_v3 }
 0x5e8   : > { %2180 = vmatprep.subr.bf16.mxu0 %v2616_v2 }
 0x5e9   : > { %2161 = vmatmul.mubr.msk.bf16.vlgmr.msra.gmra.mrb[32].mxu1 %vm441_vm2, %v1233_v11 }
 0x5ea   : > { %2173 = vmatpush3.bf16.msra.mxu1 %v2956_v5  ;;  %2176 = vmatprep.mubr.msk.bf16.mxu1 %vm2617_vm1, %v2616_v2 }
 0x5eb   : > { %2174 = vmatprep.subr.bf16.mxu1 %v2616_v2 }
 0x5ee   : > { %2175 = vmatpush3.bf16.msra.mxu1 %v2962_v6 }
 0x5ef   : > { %2188 = vmatprep.subr.bf16.mxu1 %v2616_v2 }
 0x6b4   : > { %v1271_v13 = vpop.f32.mrb[28].mxu1  ;;  %v1311_v14 = vpop.f32.mrb[32].mxu0 }
 0x6b5   : > { %v1359_v15 = vadd.f32 %v1915_v12, %v1271_v13  ;;  %v2146_v17 = vpop.f32.mrb[29].mxu1  ;;  %v2154_v18 = vpop.f32.mrb[33].mxu0  ;;  %v1368_v24 = vadd.f32 %v1917_v16, %v1311_v14 }
 0x6b6   : > { %v1274_v19 = vpop.f32.mrb[30].mxu1  ;;  %v1314_v20 = vpop.f32.mrb[34].mxu0 }
 0x6b7   : > { %v1916_v21 = vmul.f32 -1.442695, %v1359_v15  ;;  %v2147_v22 = vpop.f32.mrb[31].mxu1  ;;  %v2155_v23 = vpop.f32.mrb[35].mxu0  ;;  %v1918_v25 = vmul.f32 -1.442695, %v1368_v24 }
 0x6b8   : > { %v1933_v20 = vld [vmem:[%s2922_s17 + $0xe] sm:$0x3] }
 0x6b9   : > { %2354 = vpow2.f32 %v1916_v21  ;;  %v1935_v24 = vld [vmem:[%s2929_s11 + $0xe] sm:$0x3] }
 0x6ba   : > { %2356 = vpow2.f32 %v1918_v25 }
 0x6bc   : > { %v1351_v26 = vpop.f32.mrb[32].mxu1 }
 0x6bd   : > { %v2162_v27 = vpop.f32.mrb[33].mxu1  ;;  %v1352_v35 = vadd.f32 %v3007_v31, %v1351_v26 }
 0x6be   : > { %v1354_v28 = vpop.f32.mrb[34].mxu1 }
 0x6bf   : > { %v2163_v29 = vpop.f32.mrb[35].mxu1 }
 0x6c3   : > { %v2355_v30 = vpop.eup %2354 }
 0x6c4   : > { %v1363_v32 = vadd.f32 1.0, %v2355_v30  ;;  %v2357_v33 = vpop.eup %2356 }
 0x6c5   : > { %v1372_v34 = vadd.f32 1.0, %v2357_v33 }
 0x6c6   : > { %2358 = vrcp.f32 %v1363_v32 }
 0x6c7   : > { %2360 = vrcp.f32 %v1372_v34 }
 0x6d0   : > { %v2359_v36 = vpop.eup %2358 }
 0x6d1   : > { %v1377_v38 = vmul.f32 %v2359_v36, %v1352_v35  ;;  %v2361_v40 = vpop.eup %2360 }
 0x6d2   : > { %v1380_v41 = vsub.f32 1.0, %v2361_v40  ;;  %v1382_v43 = vmul.f32 %v2361_v40, %v1230_v10  ;;  %v1928_v10 = vld [vmem:[%s2935_s22 + $0xc] sm:$0x3] }
 0x6d3   : > { %v1378_v39 = vadd.f32 %v1919_v37, %v1377_v38 }
 0x6d5   : > { %2362 = vtanh.f32 %v1378_v39 }
 0x6df   : > { %v2363_v42 = vpop.eup %2362 }
 0x6e0   : > { %v1381_v44 = vmul.f32 %v2363_v42, %v1380_v41  ;;  %v1937_v42 = vld [vmem:[%s2935_s22 + $0xe] sm:$0x3] }
 0x6e2   : > { %v1383_v45 = vadd.f32 %v1382_v43, %v1381_v44 }
 0x6e4   : > { %1920 = vst.msk [vmem:[%s2941_s29 + $0xa] sm:$0x3] %vm619_vm3, %v1383_v45  ;;  %v1386_v46 = vpack.c.bf16 %v1383_v45, %v1383_v45 }
 0x6e6   : > { %2169 = vmatmul.mubr.msk.bf16.vlgmr.msra.gmra.mrb[36].mxu0 %vm441_vm2, %v1386_v46  ;;  %2177 = vmatmul.mubr.msk.bf16.vlgmr.msra.gmra.mrb[36].mxu1 %vm441_vm2, %v1386_v46 }
 0x6e7   : > { %2181 = vmatpush3.bf16.msra.mxu0 %v2971_v8  ;;  %2184 = vmatprep.mubr.msk.bf16.mxu0 %vm2617_vm1, %v2616_v2 }
 0x6e8   : > { %2182 = vmatprep.subr.bf16.mxu0 %v2616_v2  ;;  %2189 = vmatpush3.bf16.msra.mxu1 %v2945_v1  ;;  %v1924_v1 = vld [vmem:[%s2922_s17 + $0xc] sm:$0x3]  ;;  %s2536_s17 = scalar_lea.vmem %s2535_s14, 512 }
 0x6e9   : > { %2190 = vmatprep.subr.bf16.mxu1 %v2616_v2  ;;  %2192 = vmatprep.mubr.msk.bf16.mxu1 %vm2617_vm1, %v2616_v2  ;;  %p2538_p10 = scmp.lt.s32.totalorder %s2536_s17, %s2530_s24 }
 0x6eb   : > { %2183 = vmatpush3.bf16.msra.mxu0 %v2981_v9  ;;  %p2539_p2 = por %p2538_p10, %p2537_p8 }
 0x6ec   : > { %2196 = vmatprep.subr.bf16.mxu0 %v2616_v2  ;;  %2191 = vmatpush3.bf16.msra.mxu1 %v2948_v3 }
 0x6ed   : > { %2204 = vmatprep.subr.bf16.mxu1 %v2616_v2  ;;  %p2540_p5 = pnand %p2539_p2, %p2533_p9 }
 0x6ee   : > { %2185 = vmatmul.mubr.msk.bf16.vlgmr.msra.gmra.mrb[40].mxu0 %vm441_vm2, %v1386_v46 }
 0x6ef   : > { %2197 = vmatpush3.bf16.msra.mxu0 %v2956_v5  ;;  %2200 = vmatprep.mubr.msk.bf16.mxu0 %vm2617_vm1, %v2616_v2 }
 0x6f0   : > { %2198 = vmatprep.subr.bf16.mxu0 %v2616_v2 }
 0x6f3   : > { %2199 = vmatpush3.bf16.msra.mxu0 %v2962_v6 }
 0x7b9   : > { %v1424_v47 = vpop.f32.mrb[36].mxu0  ;;  %v1464_v48 = vpop.f32.mrb[36].mxu1 }
 0x7ba   : > { %v1512_v49 = vadd.f32 %v1924_v1, %v1424_v47  ;;  %v2170_v51 = vpop.f32.mrb[37].mxu0  ;;  %v2178_v3 = vpop.f32.mrb[37].mxu1  ;;  %v1521_v5 = vadd.f32 %v1926_v50, %v1464_v48 }
 0x7bb   : > { %v1427_v52 = vpop.f32.mrb[38].mxu0  ;;  %v1467_v53 = vpop.f32.mrb[38].mxu1 }
 0x7bc   : > { %v1925_v54 = vmul.f32 -1.442695, %v1512_v49  ;;  %v2171_v55 = vpop.f32.mrb[39].mxu0  ;;  %v2179_v56 = vpop.f32.mrb[39].mxu1  ;;  %v1927_v57 = vmul.f32 -1.442695, %v1521_v5 }
 0x7be   : > { %2364 = vpow2.f32 %v1925_v54 }
 0x7bf   : > { %2366 = vpow2.f32 %v1927_v57 }
 0x7c1   : > { %v1504_v58 = vpop.f32.mrb[40].mxu0 }
 0x7c2   : > { %v2186_v59 = vpop.f32.mrb[41].mxu0  ;;  %v1505_v4 = vadd.f32 %v3007_v31, %v1504_v58 }
 0x7c3   : > { %v1507_v60 = vpop.f32.mrb[42].mxu0 }
 0x7c4   : > { %v2187_v6 = vpop.f32.mrb[43].mxu0 }
 0x7c8   : > { %v2365_v61 = vpop.eup %2364 }
 0x7c9   : > { %v1516_v62 = vadd.f32 1.0, %v2365_v61  ;;  %v2367_v63 = vpop.eup %2366 }
 0x7ca   : > { %v1525_v0 = vadd.f32 1.0, %v2367_v63 }
 0x7cb   : > { %2368 = vrcp.f32 %v1516_v62 }
 0x7cc   : > { %2370 = vrcp.f32 %v1525_v0 }
 0x7d5   : > { %v2369_v7 = vpop.eup %2368 }
 0x7d6   : > { %v1530_v11 = vmul.f32 %v2369_v7, %v1505_v4  ;;  %v2371_v13 = vpop.eup %2370 }
 0x7d7   : > { %v1533_v14 = vsub.f32 1.0, %v2371_v13  ;;  %v1535_v16 = vmul.f32 %v2371_v13, %v1383_v45 }
 0x7d8   : > { %v1531_v12 = vadd.f32 %v1928_v10, %v1530_v11 }
 0x7da   : > { %2372 = vtanh.f32 %v1531_v12 }
 0x7e4   : > { %v2373_v15 = vpop.eup %2372 }
 0x7e5   : > { %v1534_v17 = vmul.f32 %v2373_v15, %v1533_v14 }
 0x7e7   : > { %v1536_v18 = vadd.f32 %v1535_v16, %v1534_v17 }
 0x7e9   : > { %1929 = vst.msk [vmem:[%s2941_s29 + $0xc] sm:$0x3] %vm619_vm3, %v1536_v18  ;;  %v1539_v19 = vpack.c.bf16 %v1536_v18, %v1536_v18 }
 0x7eb   : > { %2193 = vmatmul.mubr.msk.bf16.vlgmr.msra.gmra.mrb[40].mxu1 %vm441_vm2, %v1539_v19  ;;  %2201 = vmatmul.mubr.msk.bf16.vlgmr.msra.gmra.mrb[44].mxu0 %vm441_vm2, %v1539_v19 }
 0x7ec   : > { %2205 = vmatpush3.bf16.msra.mxu1 %v2971_v8  ;;  %2208 = vmatprep.mubr.msk.bf16.mxu1 %vm2617_vm1, %v2616_v2 }
 0x7ed   : > { %2206 = vmatprep.subr.bf16.mxu1 %v2616_v2 }
 0x7f0   : > { %2207 = vmatpush3.bf16.msra.mxu1 %v2981_v9 }
 0x7f3   : > { %2209 = vmatmul.mubr.msk.bf16.vlgmr.msra.gmra.mrb[44].mxu1 %vm441_vm2, %v1539_v19 }
 0x8be   : > { %v1577_v21 = vpop.f32.mrb[40].mxu1  ;;  %v1617_v22 = vpop.f32.mrb[44].mxu0 }
 0x8bf   : > { %v1665_v23 = vadd.f32 %v1933_v20, %v1577_v21  ;;  %v2194_v25 = vpop.f32.mrb[41].mxu1  ;;  %v2202_v26 = vpop.f32.mrb[45].mxu0  ;;  %v1674_v32 = vadd.f32 %v1935_v24, %v1617_v22 }
 0x8c0   : > { %v1580_v27 = vpop.f32.mrb[42].mxu1  ;;  %v1620_v28 = vpop.f32.mrb[46].mxu0 }
 0x8c1   : > { %v1934_v29 = vmul.f32 -1.442695, %v1665_v23  ;;  %v2195_v8 = vpop.f32.mrb[43].mxu1  ;;  %v2203_v30 = vpop.f32.mrb[47].mxu0  ;;  %v1936_v2 = vmul.f32 -1.442695, %v1674_v32 }
 0x8c3   : > { %2374 = vpow2.f32 %v1934_v29 }
 0x8c4   : > { %2376 = vpow2.f32 %v1936_v2 }
 0x8c6   : > { %v1657_v33 = vpop.f32.mrb[44].mxu1 }
 0x8c7   : > { %v2210_v9 = vpop.f32.mrb[45].mxu1  ;;  %v1658_v40 = vadd.f32 %v3007_v31, %v1657_v33 }
 0x8c8   : > { %v1660_v34 = vpop.f32.mrb[46].mxu1 }
 0x8c9   : > { %v2211_v35 = vpop.f32.mrb[47].mxu1 }
 0x8cd   : > { %v2375_v36 = vpop.eup %2374 }
 0x8ce   : > { %v1669_v37 = vadd.f32 1.0, %v2375_v36  ;;  %v2377_v38 = vpop.eup %2376 }
 0x8cf   : > { %v1678_v39 = vadd.f32 1.0, %v2377_v38 }
 0x8d0   : > { %2378 = vrcp.f32 %v1669_v37 }
 0x8d1   : > { %2380 = vrcp.f32 %v1678_v39 }
 0x8da   : > { %v2379_v41 = vpop.eup %2378 }
 0x8db   : > { %v1683_v43 = vmul.f32 %v2379_v41, %v1658_v40  ;;  %v2381_v45 = vpop.eup %2380 }
 0x8dc   : > { %v1686_v46 = vsub.f32 1.0, %v2381_v45  ;;  %v1688_v47 = vmul.f32 %v2381_v45, %v1536_v18 }
 0x8dd   : > { %v1684_v44 = vadd.f32 %v1937_v42, %v1683_v43 }
 0x8df   : > { %2382 = vtanh.f32 %v1684_v44 }
 0x8e9   : > { %v2383_v1 = vpop.eup %2382 }
 0x8ea   : > { %v1687_v48 = vmul.f32 %v2383_v1, %v1686_v46 }
 0x8ec   : > { %v1689_v31 = vadd.f32 %v1688_v47, %v1687_v48 }
 0x8ee   : > { %1938 = vst.msk [vmem:[%s2941_s29 + $0xe] sm:$0x3] %vm619_vm3, %v1689_v31  ;;  %1692 = vst.msk [vmem:[#allocation2] sm:$0x3] %vm619_vm3, %v1689_v31 }
 0x8ef   : > { %2543 = shalt.err (!%p2540_p5)
}
 0x8f0   : > { %s2544_s8 = scalar_lea.hbm %s3192_s10, 256  ;;  %s2548_s22 = scalar_lea.hbm %s3248_s7, 512 }
 0x8f1   : > { %p2545_p11 = scmp.ne.s32.totalorder %s3192_s10, %s2544_s8  ;;  %p2549_p1 = scmp.lt.u32.totalorder %s3192_s10, %s3248_s7 }
 0x8f2   : > { %p2550_p13 = scmp.lt.u32.totalorder %s2548_s22, %s2544_s8  ;;  %p2552_p7 = scmp.lt.u32.totalorder %s2544_s8, %s3192_s10 }
 0x8f3   : > { %p2546_p12 = pnand %p2545_p11, %p3300_p0 }
 0x8f4   : > { %p2551_p3 = por %p2550_p13, %p2549_p1 }
 0x8f5   : > { %p2547_p4 = pneg %p2546_p12 }
 0x8f6   : > { %p2553_p6 = por %p2552_p7, %p2551_p3 }
 0x8f8   : > { %p2554_p9 = pnand %p2553_p6, %p2547_p4 }
 0x8fa   : > { %2557 = shalt.err (!%p2554_p9)
}
 0x8fb   : > { %s2619_s27 = smov 32   ;;  %s2620_s23 = smov 2  }
 0x8fc   : > { %2226 = dma.vmem_to_hbm [thread:$0]  (%p3300_p0), %s3194_s19, 256, %s3192_s10, %s1694_s28, %s2619_s27, %s2619_s27, %s2620_s23  }
 0x8fd PF: > { %s3301_s18 = sld [smem:[#allocation17_spill]]  ;;  %s3302_s16 = sld [smem:[#allocation21_spill]] }
 0x8fe   : > { %s3303_s9 = sld [smem:[#allocation18_spill]] }
 0x903   : > { %s1722_s30 = sand.u32 1, %s3301_s18   ;;  %p3304_p8 = scmp.ne.s32.totalorder %s3302_s16, 0 }
 0x904   : > { %p3305_p10 = scmp.ge.s32.totalorder %s3303_s9, 2  ;;  %s1723_s20 = scalar_lea.sflag [#allocation5], %s1722_s30 }
 0x906   : > { %p2246_p2 = pnand %p3305_p10, %p3304_p8 }
 0x908   : > { %2587 = dma.done.wait (!%p2246_p2), %s1723_s20, 256  }
 0x909   : > { %2589 = vsyncadd (!%p2246_p2), %s1723_s20, 4294967040  ;;  %s3306_s27 = sld [smem:[#allocation19_spill]]  ;;  %s3307_s3 = sld [smem:[#allocation20_spill]] }
 0x90a   : > { %s3308_s24 = smov %s2596_s25  ;;  %s3309_s25 = smov %s2600_s26 }
 0x90f   : > { %p24_p5 = scmp.ge.s32.totalorder %s3306_s27, 4   ;;  %s3310_s26 = smov %s3307_s3 }
 0x911   :  { %26 = sbr.rel (!%p24_p5) target bundleno = 11 (0xb), region = 157 }
 0x918   :  { %1728 = vsyncpa [#allocation4], 1 }
 0x919   :  { %1730 = vsyncpa [#allocation4 + $0x1], 1 }
 0x91a   :  { %1731 = vsyncpa [#allocation7], 1 }
 0x91b   :  { %1733 = vsyncpa [#allocation7 + $0x1], 1 }
 0x91c   :  { %1734 = vsyncpa [#allocation10], 1 }
 0x91d   :  { %1735 = vsyncpa [#allocation5], 1 }
 0x91e   :  { %1737 = vsyncpa [#allocation5 + $0x1], 1 }

</bundles_post_ra>
